<compile_context>
chip_gen: v7x
topology: tpu7x:2x2x1
jax: 0.10.0
libtpu: 0.0.40
codegen_flags: <defaults>
</compile_context>

<pallas_src>
import jax
import jax.numpy as jnp
from jax.experimental import pallas as pl
from jax.experimental.pallas import tpu as pltpu

N_SUPERVISION = 13
HIDDEN = 768                 # deberta backbone hidden size (module hard-codes 768)
INTER = 512                  # regression head intermediate size
N_GROUPS = 2                 # head groups (one per v7x TensorCore)
G_HEADS = 7                  # heads per group; 13 heads padded to 14 = 2 * 7
N_PAD = N_GROUPS * G_HEADS
K_CHUNK = 256                # HIDDEN reduction chunk (3 pipeline steps per group)
K_CHUNKS = HIDDEN // K_CHUNK
GN = G_HEADS * INTER         # 3584 layer-1 units per group (MXU N dimension)
MAX_B_TILE = 256             # batch rows per grid step (caps the f32 accumulator)


def heads_kernel(x_ref, w1_ref, p_ref, o_ref, acc_ref):
    """One grid step = (head group g, batch tile i, K chunk k).

    x_ref  : (b_tile, K_CHUNK)   bf16  CLS feature chunk (batch on sublanes)
    w1_ref : (1, K_CHUNK, GN)    int8  quantized layer-1 weight chunk
    p_ref  : (1, 3, GN)          f32   row0: b1/s, row1: w2*s, row2: b2/INTER (replicated)
    o_ref  : (b_tile, G_HEADS)   f32   this (group, batch-tile) output block
    acc_ref: (b_tile, GN)        f32   layer-1 accumulator (persists over k)
    """
    k = pl.program_id(2)

    @pl.when(k == 0)
    def _():
        acc_ref[...] = jnp.zeros_like(acc_ref)

    # Layer 1 partial product on the MXU.  int8 -> bf16 cast is exact
    # (|q| <= 127) and its VPU cost hides under the weight DMA.
    w = w1_ref[0].astype(jnp.bfloat16)                         # (K_CHUNK, GN)
    acc_ref[...] += jnp.dot(x_ref[...], w,
                            preferred_element_type=jnp.float32)

    @pl.when(k == pl.num_programs(2) - 1)
    def _():
        p = p_ref[0]                                           # (3, GN) f32
        # ReLU(s*a + b1) = s*ReLU(a + b1/s); w2' = w2*s; b2 is pre-divided by
        # INTER so the per-head lane reduction absorbs it.  All broadcasts are
        # lane-dense (1, GN) rows along sublanes (free).
        prod = (jnp.maximum(acc_ref[...] + p[0:1, :], 0.0) * p[1:2, :]
                + p[2:3, :])                                   # (b_tile, GN) f32
        # Layer 2: per-head reduction over its 512 lanes (XLU; hidden under DMA).
        for h in range(G_HEADS):
            seg = prod[:, h * INTER:(h + 1) * INTER]
            o_ref[:, h:h + 1] = jnp.sum(seg, axis=1, keepdims=True)


def prepare_head_params(w1, b1, w2, b2):
    """One-time (offline) quantize + repack of the regression-head parameters.

    w1: (N, HIDDEN, INTER)  b1: (N, 1, INTER)  w2: (N, 1, INTER)  b2: (1, N)
    Returns:
      w1q   : (N_GROUPS, HIDDEN, GN) int8  per-unit abs-max quantized layer-1 weights
      params: (N_GROUPS, 3, GN)      f32   [g,0]=b1/s  [g,1]=w2*s  [g,2]=b2/INTER
    """
    n = w1.shape[0]
    pad = N_PAD - n
    w1p = jnp.pad(w1, ((0, pad), (0, 0), (0, 0)))
    b1p = jnp.pad(b1, ((0, pad), (0, 0), (0, 0)))
    w2p = jnp.pad(w2, ((0, pad), (0, 0), (0, 0)))
    b2p = jnp.pad(b2, ((0, 0), (0, pad)))

    # Per-output-unit abs-max int8 scale (kept strictly positive so the ReLU
    # scale fold is valid; padded heads quantize to exact zeros).
    s = jnp.maximum(jnp.max(jnp.abs(w1p), axis=1), 1e-30) / 127.0      # (N_PAD, INTER)
    q = jnp.clip(jnp.round(w1p / s[:, None, :]), -127, 127).astype(jnp.int8)

    b1f = b1p[:, 0, :] / s                                             # (N_PAD, INTER)
    w2f = w2p[:, 0, :] * s
    b2f = jnp.repeat(b2p.reshape(N_PAD, 1), INTER, axis=1) / float(INTER)

    w1q = (q.reshape(N_GROUPS, G_HEADS, HIDDEN, INTER)
             .transpose(0, 2, 1, 3)
             .reshape(N_GROUPS, HIDDEN, GN))
    params = jnp.stack([b1f.reshape(N_GROUPS, GN),
                        w2f.reshape(N_GROUPS, GN),
                        b2f.reshape(N_GROUPS, GN)], axis=1).astype(jnp.float32)
    return w1q, params


@jax.jit
def deberta_heads_forward(hidden_states, w1q, params):
    """hidden_states: (B, S, HIDDEN) backbone output; returns (B, 13)."""
    cls = hidden_states[:, 0, :]                              # glue: [0][:, 0, :]
    b = cls.shape[0]
    if b <= MAX_B_TILE:
        b_tile = ((b + 7) // 8) * 8                           # sublane-align the batch
        b_pad = b_tile
    else:                                                     # large batches: tile them so
        b_tile = MAX_B_TILE                                   # the f32 accumulator stays small
        b_pad = ((b + MAX_B_TILE - 1) // MAX_B_TILE) * MAX_B_TILE
    n_bt = b_pad // b_tile

    x = jnp.pad(cls, ((0, b_pad - b), (0, 0))).astype(jnp.bfloat16)    # (b_pad, HIDDEN)

    out = pl.pallas_call(
        heads_kernel,
        out_shape=jax.ShapeDtypeStruct((N_GROUPS * b_pad, G_HEADS), jnp.float32),
        grid_spec=pltpu.PrefetchScalarGridSpec(
            num_scalar_prefetch=0,
            grid=(N_GROUPS, n_bt, K_CHUNKS),
            in_specs=[
                pl.BlockSpec((b_tile, K_CHUNK), lambda g, i, k: (i, k)),
                pl.BlockSpec((1, K_CHUNK, GN), lambda g, i, k: (g, k, 0)),
                pl.BlockSpec((1, 3, GN), lambda g, i, k: (g, 0, 0)),
            ],
            out_specs=pl.BlockSpec((b_tile, G_HEADS),
                                   lambda g, i, k: (g * n_bt + i, 0)),
            scratch_shapes=[pltpu.VMEM((b_tile, GN), jnp.float32)],
        ),
        compiler_params=pltpu.CompilerParams(
            # Head-group / batch-tile axes write disjoint output blocks ->
            # parallel (the 2 head groups shard across v7x's TensorCores);
            # the K-reduction axis carries the accumulator -> arbitrary.
            dimension_semantics=("parallel", "parallel", "arbitrary"),
            # Working set is ~2-6 MiB (int8 weight double-buffer + bf16 unpack
            # temp + f32 accumulator); 24 MiB leaves headroom on every chip.
            vmem_limit_bytes=24 << 20,
        ),
    )(x, w1q, params)

    # (N_GROUPS * b_pad, 7) -> (B, 13); padded batch rows / padded head sliced off.
    out = out.reshape(N_GROUPS, b_pad, G_HEADS)
    out = jnp.transpose(out, (1, 0, 2)).reshape(b_pad, N_GROUPS * G_HEADS)
    return out[:b, :N_SUPERVISION]


def reference_forward(hidden_states, w1, b1, w2, b2):
    """Pure-JAX f32 reference mirroring the PyTorch head loop."""
    cls = hidden_states[:, 0, :]                              # (B, HIDDEN)
    outs = []
    for h in range(w1.shape[0]):
        y = jnp.maximum(cls @ w1[h] + b1[h, 0], 0.0)          # (B, INTER)
        y = y @ w2[h, 0][:, None] + b2[0, h]                  # (B, 1)
        outs.append(y)
    return jnp.concatenate(outs, axis=1)                      # (B, 13)


def reference_forward_quant(hidden_states, w1, b1, w2, b2):
    """Reference matching the kernel numerics (bf16 x, int8 w1, folded scales)."""
    cls = hidden_states[:, 0, :].astype(jnp.bfloat16)
    s = jnp.maximum(jnp.max(jnp.abs(w1), axis=1), 1e-30) / 127.0       # (N, INTER)
    q = jnp.clip(jnp.round(w1 / s[:, None, :]), -127, 127).astype(jnp.int8)
    outs = []
    for h in range(w1.shape[0]):
        a = jnp.dot(cls, q[h].astype(jnp.bfloat16),
                    preferred_element_type=jnp.float32)
        y = jnp.maximum(a + b1[h, 0] / s[h], 0.0) * (w2[h, 0] * s[h])
        y = jnp.sum(y, axis=1, keepdims=True) + b2[0, h]
        outs.append(y)
    return jnp.concatenate(outs, axis=1)


if __name__ == "__main__":
    key = jax.random.PRNGKey(0)
    k_x, k_w1, k_b1, k_w2, k_b2 = jax.random.split(key, 5)

    B, S = 2, 8
    # Synthetic backbone hidden states (stand-in for DeBERTa output[0]).
    hidden_states = jax.random.normal(k_x, (B, S, HIDDEN), dtype=jnp.float32)

    # Deterministic head parameters (shapes from the module's __init__).
    lim1 = 1.0 / (HIDDEN ** 0.5)
    lim2 = 1.0 / (INTER ** 0.5)
    w1 = jax.random.uniform(k_w1, (N_SUPERVISION, HIDDEN, INTER),
                            minval=-lim1, maxval=lim1, dtype=jnp.float32)
    b1 = jax.random.uniform(k_b1, (N_SUPERVISION, 1, INTER),
                            minval=-lim1, maxval=lim1, dtype=jnp.float32)
    w2 = jax.random.uniform(k_w2, (N_SUPERVISION, 1, INTER),
                            minval=-lim2, maxval=lim2, dtype=jnp.float32)
    b2 = jax.random.uniform(k_b2, (1, N_SUPERVISION),
                            minval=-lim2, maxval=lim2, dtype=jnp.float32)

    # One-time weight quantize + repack (offline in a real serving path).
    w1q, params = prepare_head_params(w1, b1, w2, b2)

    out = deberta_heads_forward(hidden_states, w1q, params)
    out = jax.block_until_ready(out)
    assert out.shape == (B, N_SUPERVISION), out.shape

    # Exact-numerics check (same int8 quantization / scale fold as the kernel).
    ref_q = reference_forward_quant(hidden_states, w1, b1, w2, b2)
    assert jnp.allclose(out, ref_q, atol=2e-3, rtol=2e-3), (out, ref_q)

    # Semantics check against the full-f32 PyTorch-equivalent forward
    # (int8 weight streaming introduces small absolute differences).
    ref_f = reference_forward(hidden_states, w1, b1, w2, b2)
    assert jnp.allclose(out, ref_f, atol=5e-2, rtol=5e-2), (out, ref_f)

    print("KERNEL_OK")
</pallas_src>

<mosaic_0001>
module attributes {stable_mosaic.version = 11 : i64} {
  func.func @heads_kernel(%arg0: i32, %arg1: i32, %arg2: i32, %arg3: memref<8x256xbf16, #tpu.memory_space<vmem>>, %arg4: memref<1x256x3584xi8, #tpu.memory_space<vmem>>, %arg5: memref<1x3x3584xf32, #tpu.memory_space<vmem>>, %arg6: memref<8x7xf32, #tpu.memory_space<vmem>>, %arg7: memref<8x3584xf32, #tpu.memory_space<vmem>>) attributes {dimension_semantics = [#tpu.dimension_semantics<parallel>, #tpu.dimension_semantics<parallel>, #tpu.dimension_semantics<arbitrary>], iteration_bounds = array<i64: 2, 1, 3>, scalar_prefetch = 0 : i64, scratch_operands = 1 : i64, tpu.core_type = #tpu.core_type<tc>, window_params = [{transform_indices = @transform_0, window_bounds = array<i64: 8, 256>}, {transform_indices = @transform_1, window_bounds = array<i64: 1, 256, 3584>}, {transform_indices = @transform_2, window_bounds = array<i64: 1, 3, 3584>}, {transform_indices = @transform_3, window_bounds = array<i64: 8, 7>}]} {
    %c0_i32 = arith.constant 0 : i32
    %0 = arith.cmpi eq, %arg2, %c0_i32 : i32
    %1 = arith.extui %0 : i1 to i32
    %c0_i32_0 = arith.constant 0 : i32
    %2 = arith.cmpi ne, %1, %c0_i32_0 : i32
    scf.if %2 {
      %cst_10 = arith.constant 0.000000e+00 : f32
      %14 = vector.broadcast %cst_10 : f32 to vector<8x3584xf32>
      %c0_11 = arith.constant 0 : index
      %c0_12 = arith.constant 0 : index
      %15 = vector.load %arg7[%c0_11, %c0_12] : memref<8x3584xf32, #tpu.memory_space<vmem>>, vector<8x3584xf32>
      tpu.vector_store %arg7[%c0_11, %c0_12], %14 {strides = array<i32>} : memref<8x3584xf32, #tpu.memory_space<vmem>>, vector<8x3584xf32>,
    } else {
    }
    %c0 = arith.constant 0 : index
    %c0_1 = arith.constant 0 : index
    %c0_2 = arith.constant 0 : index
    %3 = vector.load %arg4[%c0, %c0_1, %c0_2] : memref<1x256x3584xi8, #tpu.memory_space<vmem>>, vector<1x256x3584xi8>
    %4 = vector.shape_cast %3 : vector<1x256x3584xi8> to vector<256x3584xi8>
    %5 = arith.sitofp %4 : vector<256x3584xi8> to vector<256x3584xbf16>
    %c0_3 = arith.constant 0 : index
    %c0_4 = arith.constant 0 : index
    %6 = vector.load %arg7[%c0_3, %c0_4] : memref<8x3584xf32, #tpu.memory_space<vmem>>, vector<8x3584xf32>
    %c0_5 = arith.constant 0 : index
    %c0_6 = arith.constant 0 : index
    %7 = vector.load %arg3[%c0_5, %c0_6] : memref<8x256xbf16, #tpu.memory_space<vmem>>, vector<8x256xbf16>
    %cst = arith.constant dense<0.000000e+00> : vector<8x3584xf32>
    %8 = tpu.matmul %7, %5, %cst {dimension_numbers = #tpu.dot_dimension_numbers<[1], [0], [0], [1], [0, 0, 1, 1], [], []>} : vector<8x256xbf16>, vector<256x3584xbf16>, vector<8x3584xf32> -> vector<8x3584xf32>
    %9 = arith.addf %6, %8 : vector<8x3584xf32>
    %c0_7 = arith.constant 0 : index
    %c0_8 = arith.constant 0 : index
    %10 = vector.load %arg7[%c0_7, %c0_8] : memref<8x3584xf32, #tpu.memory_space<vmem>>, vector<8x3584xf32>
    tpu.vector_store %arg7[%c0_7, %c0_8], %9 {strides = array<i32>} : memref<8x3584xf32, #tpu.memory_space<vmem>>, vector<8x3584xf32>,
    %c2_i32 = arith.constant 2 : i32
    %11 = arith.cmpi eq, %arg2, %c2_i32 : i32
    %12 = arith.extui %11 : i1 to i32
    %c0_i32_9 = arith.constant 0 : i32
    %13 = arith.cmpi ne, %12, %c0_i32_9 : i32
    scf.if %13 {
      %c0_10 = arith.constant 0 : index
      %c0_11 = arith.constant 0 : index
      %c0_12 = arith.constant 0 : index
      %14 = vector.load %arg5[%c0_10, %c0_11, %c0_12] : memref<1x3x3584xf32, #tpu.memory_space<vmem>>, vector<1x3x3584xf32>
      %15 = vector.shape_cast %14 : vector<1x3x3584xf32> to vector<3x3584xf32>
      %c0_13 = arith.constant 0 : index
      %c0_14 = arith.constant 0 : index
      %16 = vector.load %arg7[%c0_13, %c0_14] : memref<8x3584xf32, #tpu.memory_space<vmem>>, vector<8x3584xf32>
      %17 = vector.extract_strided_slice %15 {offsets = [0, 0], sizes = [1, 3584], strides = [1, 1]} : vector<3x3584xf32> to vector<1x3584xf32>
      %18 = vector.broadcast %17 : vector<1x3584xf32> to vector<8x3584xf32>
      %19 = arith.addf %16, %18 : vector<8x3584xf32>
      %cst_15 = arith.constant 0.000000e+00 : f32
      %20 = vector.broadcast %cst_15 : f32 to vector<8x3584xf32>
      %21 = arith.maximumf %19, %20 : vector<8x3584xf32>
      %22 = vector.extract_strided_slice %15 {offsets = [1, 0], sizes = [1, 3584], strides = [1, 1]} : vector<3x3584xf32> to vector<1x3584xf32>
      %23 = vector.broadcast %22 : vector<1x3584xf32> to vector<8x3584xf32>
      %24 = arith.mulf %21, %23 : vector<8x3584xf32>
      %25 = vector.extract_strided_slice %15 {offsets = [2, 0], sizes = [1, 3584], strides = [1, 1]} : vector<3x3584xf32> to vector<1x3584xf32>
      %26 = vector.broadcast %25 : vector<1x3584xf32> to vector<8x3584xf32>
      %27 = arith.addf %24, %26 : vector<8x3584xf32>
      %28 = vector.extract_strided_slice %27 {offsets = [0, 0], sizes = [8, 512], strides = [1, 1]} : vector<8x3584xf32> to vector<8x512xf32>
      %cst_16 = arith.constant dense<0.000000e+00> : vector<8xf32>
      %29 = vector.multi_reduction <add>, %28, %cst_16 [1] : vector<8x512xf32> to vector<8xf32>
      %30 = vector.shape_cast %29 : vector<8xf32> to vector<8x1xf32>
      %c0_17 = arith.constant 0 : index
      %c0_18 = arith.constant 0 : index
      %31 = vector.load %arg6[%c0_17, %c0_18] : memref<8x7xf32, #tpu.memory_space<vmem>>, vector<8x1xf32>
      tpu.vector_store %arg6[%c0_17, %c0_18], %30 {strides = array<i32>} : memref<8x7xf32, #tpu.memory_space<vmem>>, vector<8x1xf32>,
      %32 = vector.extract_strided_slice %27 {offsets = [0, 512], sizes = [8, 512], strides = [1, 1]} : vector<8x3584xf32> to vector<8x512xf32>
      %cst_19 = arith.constant dense<0.000000e+00> : vector<8xf32>
      %33 = vector.multi_reduction <add>, %32, %cst_19 [1] : vector<8x512xf32> to vector<8xf32>
      %34 = vector.shape_cast %33 : vector<8xf32> to vector<8x1xf32>
      %c0_20 = arith.constant 0 : index
      %c1 = arith.constant 1 : index
      %35 = vector.load %arg6[%c0_20, %c1] : memref<8x7xf32, #tpu.memory_space<vmem>>, vector<8x1xf32>
      tpu.vector_store %arg6[%c0_20, %c1], %34 {strides = array<i32>} : memref<8x7xf32, #tpu.memory_space<vmem>>, vector<8x1xf32>,
      %36 = vector.extract_strided_slice %27 {offsets = [0, 1024], sizes = [8, 512], strides = [1, 1]} : vector<8x3584xf32> to vector<8x512xf32>
      %cst_21 = arith.constant dense<0.000000e+00> : vector<8xf32>
      %37 = vector.multi_reduction <add>, %36, %cst_21 [1] : vector<8x512xf32> to vector<8xf32>
      %38 = vector.shape_cast %37 : vector<8xf32> to vector<8x1xf32>
      %c0_22 = arith.constant 0 : index
      %c2 = arith.constant 2 : index
      %39 = vector.load %arg6[%c0_22, %c2] : memref<8x7xf32, #tpu.memory_space<vmem>>, vector<8x1xf32>
      tpu.vector_store %arg6[%c0_22, %c2], %38 {strides = array<i32>} : memref<8x7xf32, #tpu.memory_space<vmem>>, vector<8x1xf32>,
      %40 = vector.extract_strided_slice %27 {offsets = [0, 1536], sizes = [8, 512], strides = [1, 1]} : vector<8x3584xf32> to vector<8x512xf32>
      %cst_23 = arith.constant dense<0.000000e+00> : vector<8xf32>
      %41 = vector.multi_reduction <add>, %40, %cst_23 [1] : vector<8x512xf32> to vector<8xf32>
      %42 = vector.shape_cast %41 : vector<8xf32> to vector<8x1xf32>
      %c0_24 = arith.constant 0 : index
      %c3 = arith.constant 3 : index
      %43 = vector.load %arg6[%c0_24, %c3] : memref<8x7xf32, #tpu.memory_space<vmem>>, vector<8x1xf32>
      tpu.vector_store %arg6[%c0_24, %c3], %42 {strides = array<i32>} : memref<8x7xf32, #tpu.memory_space<vmem>>, vector<8x1xf32>,
      %44 = vector.extract_strided_slice %27 {offsets = [0, 2048], sizes = [8, 512], strides = [1, 1]} : vector<8x3584xf32> to vector<8x512xf32>
      %cst_25 = arith.constant dense<0.000000e+00> : vector<8xf32>
      %45 = vector.multi_reduction <add>, %44, %cst_25 [1] : vector<8x512xf32> to vector<8xf32>
      %46 = vector.shape_cast %45 : vector<8xf32> to vector<8x1xf32>
      %c0_26 = arith.constant 0 : index
      %c4 = arith.constant 4 : index
      %47 = vector.load %arg6[%c0_26, %c4] : memref<8x7xf32, #tpu.memory_space<vmem>>, vector<8x1xf32>
      tpu.vector_store %arg6[%c0_26, %c4], %46 {strides = array<i32>} : memref<8x7xf32, #tpu.memory_space<vmem>>, vector<8x1xf32>,
      %48 = vector.extract_strided_slice %27 {offsets = [0, 2560], sizes = [8, 512], strides = [1, 1]} : vector<8x3584xf32> to vector<8x512xf32>
      %cst_27 = arith.constant dense<0.000000e+00> : vector<8xf32>
      %49 = vector.multi_reduction <add>, %48, %cst_27 [1] : vector<8x512xf32> to vector<8xf32>
      %50 = vector.shape_cast %49 : vector<8xf32> to vector<8x1xf32>
      %c0_28 = arith.constant 0 : index
      %c5 = arith.constant 5 : index
      %51 = vector.load %arg6[%c0_28, %c5] : memref<8x7xf32, #tpu.memory_space<vmem>>, vector<8x1xf32>
      tpu.vector_store %arg6[%c0_28, %c5], %50 {strides = array<i32>} : memref<8x7xf32, #tpu.memory_space<vmem>>, vector<8x1xf32>,
      %52 = vector.extract_strided_slice %27 {offsets = [0, 3072], sizes = [8, 512], strides = [1, 1]} : vector<8x3584xf32> to vector<8x512xf32>
      %cst_29 = arith.constant dense<0.000000e+00> : vector<8xf32>
      %53 = vector.multi_reduction <add>, %52, %cst_29 [1] : vector<8x512xf32> to vector<8xf32>
      %54 = vector.shape_cast %53 : vector<8xf32> to vector<8x1xf32>
      %c0_30 = arith.constant 0 : index
      %c6 = arith.constant 6 : index
      %55 = vector.load %arg6[%c0_30, %c6] : memref<8x7xf32, #tpu.memory_space<vmem>>, vector<8x1xf32>
      tpu.vector_store %arg6[%c0_30, %c6], %54 {strides = array<i32>} : memref<8x7xf32, #tpu.memory_space<vmem>>, vector<8x1xf32>,
    } else {
    }
    return
  }
  func.func @transform_0(%arg0: i32, %arg1: i32, %arg2: i32) -> (i32, i32) {
    %c0_i32 = arith.constant 0 : i32
    return %arg1, %arg2 : i32, i32
  }
  func.func @transform_1(%arg0: i32, %arg1: i32, %arg2: i32) -> (i32, i32, i32) {
    %c0_i32 = arith.constant 0 : i32
    %c0_i32_0 = arith.constant 0 : i32
    return %arg0, %arg2, %c0_i32 : i32, i32, i32
  }
  func.func @transform_2(%arg0: i32, %arg1: i32, %arg2: i32) -> (i32, i32, i32) {
    %c0_i32 = arith.constant 0 : i32
    %c0_i32_0 = arith.constant 0 : i32
    %c0_i32_1 = arith.constant 0 : i32
    return %arg0, %c0_i32, %c0_i32_0 : i32, i32, i32
  }
  func.func @transform_3(%arg0: i32, %arg1: i32, %arg2: i32) -> (i32, i32) {
    %c1_i32 = arith.constant 1 : i32
    %0 = arith.muli %arg0, %c1_i32 : i32
    %1 = arith.addi %0, %arg1 : i32
    %c0_i32 = arith.constant 0 : i32
    %c0_i32_0 = arith.constant 0 : i32
    return %1, %c0_i32 : i32, i32
  }
}

</mosaic_0001>

<bundles_post_ra>
// kernel: deberta_heads_forward.1
= control target key start
LH: loop header
LB: loop body
LE: loop exit
PB: predicated region body
PF: predicated region fallthrough
CT: control target
= control target key end

     0   :  { %8 = vsyncpa [#allocation4], 0  ;;  %s3646_s0 = inlined_call_operand.vmem [shape: bf16[8,768], index: 0, kind: input, shape index: {}]   ;;  %s3647_s1 = inlined_call_operand.hbm [shape: s8[2,768,3584], index: 1, kind: input, shape index: {}]   ;;  %s3648_s2 = inlined_call_operand.vmem [shape: f32[2,3,3584], index: 2, kind: input, shape index: {}]   ;;  %s3649_s3 = inlined_call_operand.vmem [shape: f32[16,7], index: 3, kind: output, shape index: {}]  }
   0x1   :  { %10 = vsyncpa [#allocation4 + $0x1], 0  ;;  %s2958_s12 = smov 0   ;;  %s2960_s13 = smov 0  }
   0x2   :  { %s2962_s14 = smov 0   ;;  %s2964_s15 = smov 0  }
   0x3   :  { %s2966_s16 = smov 0   ;;  %s2968_s17 = smov 0  }
   0x4   :  { %s2970_s18 = smov 0   ;;  %s2972_s19 = smov 0  }
   0x5 LB: > { %s2737_s20 = sadd.s32 4294967295, %s2932_s19   ;;  %s28_s21 = sadd.s32 1, %s2924_s17  ;;  %s2932_s19 = sphi %s2972_s19, %s16_s19   ;;  %s2928_s18 = sphi %s2970_s18, %s3659_s18   ;;  %s2924_s17 = sphi %s2968_s17, %s3658_s17   ;;  %s2920_s16 = sphi %s2966_s16, %s3657_s16   ;;  %s2916_s15 = sphi %s2964_s15, %s3656_s15   ;;  %s2912_s14 = sphi %s2962_s14, %s3655_s14   ;;  %s2908_s13 = sphi %s2960_s13, %s3654_s13   ;;  %s2904_s12 = sphi %s2958_s12, %s3653_s12  }
   0x6   : > { %p29_p0 = scmp.ge.s32.totalorder %s28_s21, 3  ;;  %s35_s22 = sadd.s32 1, %s2928_s18 }
   0x7   : > { %s72_s23 = sadd.s32 1, %s2912_s14  ;;  %p79_p1 = scmp.ne.s32.totalorder %s2912_s14, %s2908_s13 }
   0x8   : > { %s3661_s21 = smov (%p29_p0, %s28_s21), 0  ;;  %s3663_s22 = smov (!%p29_p0, %s35_s22), %s2928_s18 }
   0x9   : > { %s68_s24 = ssub.s32 %s2924_s17, %s3661_s21  ;;  %p80_p2 = scmp.eq.s32.totalorder %s2932_s19, 0 }
   0xa   : > { %p37_p3 = scmp.ge.s32.totalorder %s3663_s22, 2  ;;  %p85_p4 = scmp.ne.s32.totalorder %s2908_s13, %s2904_s12 }
   0xb   : > { %p81_p5 = por %p80_p2, %p79_p1  ;;  %p86_p6 = scmp.eq.s32.totalorder %s2737_s20, 0 }
   0xc   : > { %s3665_s22 = smov (%p37_p3, %s3663_s22), 0  ;;  %p2766_p8 = scmp.lt.s32.totalorder %s2932_s19, 6 }
   0xd   : > { %p3011_p7 = por %p86_p6, %p85_p4  ;;  %s67_s26 = ssub.s32 %s2928_s18, %s3665_s22 }
   0xe   : > { %s69_s27 = sor.u32 %s68_s24, %s67_s26  ;;  %s176_s28 = sand.u32 1, %s2912_s14  }
   0xf   : > { %p70_p9 = scmp.eq.s32.totalorder %s69_s27, 0  ;;  %s2755_s29 = smul.u32 1792, %s176_s28 }
  0x10   : > { %p3019_p10 = pnand %p2766_p8, %p81_p5  ;;  %s2756_s5 = smul.u32 224, %s2924_s17 }
  0x11   : > { %s3024_s4 = scalar_select %p70_p9, %s2912_s14, %s72_s23  }
  0x12   : > { %s2757_s6 = smul.u32 672, %s2928_s18  ;;  %s180_s7 = scalar_lea.vmem [#allocation3], %s2755_s29 }
  0x13   : > { %s190_s8 = sshll.u32 %s180_s7, 4  ;;  %s3036_s23 = scalar_lea.sflag [#allocation4], %s176_s28  ;;  %s3028_s8 = int_to_ptr.vmem [resolvable:$true] %s190_s8 }
  0x14   : > { %s187_s9 = sadd.s32 %s2757_s6, %s2756_s5  ;;  %p2838_p13 = pneg %p3019_p10 }
  0x15   : > { %s2743_s10 = sshll.u32 %s187_s9, 7  ;;  %s2841_s29 = scalar_lea.hbm %s3647_s1, 172032 }
  0x16   : > { %s3033_s20 = scalar_lea.hbm %s3647_s1, %s2743_s10 }
  0x17   : > { %s2836_s24 = scalar_lea.hbm %s3033_s20, 28672  ;;  %p2842_p2 = scmp.lt.u32.totalorder %s3033_s20, %s3647_s1 }
  0x18   : > { %p2837_p12 = scmp.ne.s32.totalorder %s3033_s20, %s2836_s24  ;;  %p2843_p3 = scmp.lt.u32.totalorder %s2841_s29, %s2836_s24 }
  0x19   : > { %p2845_p5 = scmp.lt.u32.totalorder %s2836_s24, %s3033_s20 }
  0x1a   : > { %p2839_p0 = pnand %p2838_p13, %p2837_p12  ;;  %p2844_p4 = por %p2843_p3, %p2842_p2 }
  0x1c   : > { %p2840_p1 = pneg %p2839_p0  ;;  %p2846_p6 = por %p2845_p5, %p2844_p4 }
  0x1e   : > { %p2847_p8 = pnand %p2846_p6, %p2840_p1 }
  0x20   : > { %2850 = shalt.err (!%p2847_p8)
}
  0x21   : > { %s2851_s28 = scalar_lea.vmem %s3028_s8, 28672  ;;  %s2934_s7 = smov [#allocation3]  }
  0x22   : > { %p2852_p9 = scmp.ne.s32.totalorder %s3028_s8, %s2851_s28  ;;  %s2856_s9 = sshll.u32 %s2934_s7, 4  ;;  %s2857_s9 = int_to_ptr.vmem [resolvable:$false] %s2856_s9 }
  0x23   : > { %s2858_s10 = scalar_lea.vmem %s2857_s9, 57344  ;;  %p2859_p11 = scmp.lt.s32.totalorder %s3028_s8, %s2857_s9 }
  0x24   : > { %p2854_p12 = pnand %p2852_p9, %p2838_p13  ;;  %p2860_p2 = scmp.lt.s32.totalorder %s2858_s10, %s2851_s28 }
  0x26   : > { %p2855_p0 = pneg %p2854_p12  ;;  %p2861_p3 = por %p2860_p2, %p2859_p11 }
  0x28   : > { %p2862_p4 = pnand %p2861_p3, %p2855_p0 }
  0x2a   : > { %2865 = shalt.err (!%p2862_p4)
}
  0x2b   : > { %s2935_s11 = smov 3584   ;;  %s2936_s12 = smov 224  }
  0x2c   : > { %2765 = dma.hbm_to_vmem [thread:$0]  (!%p3019_p10), %s3033_s20, 28672, %s3028_s8, %s3036_s23, %s2935_s11, %s2935_s11, %s2936_s12  }
  0x2d   : > { %p206_p13 = scmp.lt.s32.totalorder %s2932_s19, 7  ;;  %p3652_p1 = scmp.ge.s32.totalorder %s2932_s19, 1 }
  0x2f   : > { %p207_p5 = pnand %p3652_p1, %p206_p13 }
  0x30   : > { %s212_s24 = sand.u32 (!%p207_p5), 1, %s2908_s13  }
  0x31   : > { %210 = sbr.rel (%p207_p5) target bundleno = 954 (0x3ba), region = 32  ;;  %s213_s27 = scalar_lea.sflag (!%p207_p5), [#allocation4], %s212_s24 }
  0x32   : > { %s2758_s26 = smul.u32 (!%p207_p5), 1792, %s212_s24 }
  0x34   : > { %s3068_s29 = scalar_lea.vmem (!%p207_p5), [#allocation3], %s2758_s26 }
  0x38   : > { %2899 = dma.done.wait (%p3011_p7), %s213_s27, 28672  }
  0x39   : > { %2901 = vsyncadd (%p3011_p7), %s213_s27, 4294938624  ;;  %s2745_s30 = sshll.u32 %s2916_s15, 1  ;;  %p264_p10 = scmp.lt.s32.totalorder %s2920_s16, 1 }
  0x3a   : > { %p256_p11 = scmp.lt.s32.totalorder %s2745_s30, 5  ;;  %p2749_p7 = scmp.ne.s32.totalorder %s2916_s15, 0 }
  0x3b   : > { %s3667_s16 = smov (!%p264_p10, %s2920_s16), 1  ;;  %v2937_v0 = vmov (!%p2749_p7), 0.0  }
  0x3c   : > { %s3669_s30 = smov (!%p256_p11, %s2745_s30), 5  ;;  %s2759_s8 = smul.u32 112, %s3667_s16  ;;  %279 = vst [vmem:[#allocation2] sm:$0xff] (!%p2749_p7), %v2937_v0  ;;  %280 = vst [vmem:[#allocation2 + $0x8] sm:$0xff] (!%p2749_p7), %v2937_v0 }
  0x3d   : > { %s2748_s20 = sshll.u32 %s3667_s16, 3  ;;  %s2746_s23 = sshll.u32 %s3669_s30, 2  ;;  %281 = vst [vmem:[#allocation2 + $0x10] sm:$0xff] (!%p2749_p7), %v2937_v0  ;;  %282 = vst [vmem:[#allocation2 + $0x18] sm:$0xff] (!%p2749_p7), %v2937_v0 }
  0x3e   : > { %s3080_s28 = scalar_lea.vmem %s3649_s3, %s2748_s20  ;;  %s3085_s25 = scalar_lea.vmem %s3646_s0, %s2746_s23  ;;  %283 = vst [vmem:[#allocation2 + $0x20] sm:$0xff] (!%p2749_p7), %v2937_v0  ;;  %284 = vst [vmem:[#allocation2 + $0x28] sm:$0xff] (!%p2749_p7), %v2937_v0 }
  0x3f   : > { %s3090_s12 = scalar_lea.vmem %s3648_s2, %s2759_s8  ;;  %278 = sbr.rel (%p2749_p7) target bundleno = 74 (0x4a), region = 40  ;;  %285 = vst [vmem:[#allocation2 + $0x30] sm:$0xff] (!%p2749_p7), %v2937_v0  ;;  %286 = vst [vmem:[#allocation2 + $0x38] sm:$0xff] (!%p2749_p7), %v2937_v0 }
  0x40   : > { %287 = vst [vmem:[#allocation2 + $0x40] sm:$0xff] (!%p2749_p7), %v2937_v0  ;;  %288 = vst [vmem:[#allocation2 + $0x48] sm:$0xff] (!%p2749_p7), %v2937_v0 }
  0x41   : > { %289 = vst [vmem:[#allocation2 + $0x50] sm:$0xff] (!%p2749_p7), %v2937_v0  ;;  %290 = vst [vmem:[#allocation2 + $0x58] sm:$0xff] (!%p2749_p7), %v2937_v0 }
  0x42   : > { %291 = vst [vmem:[#allocation2 + $0x60] sm:$0xff] (!%p2749_p7), %v2937_v0  ;;  %292 = vst [vmem:[#allocation2 + $0x68] sm:$0xff] (!%p2749_p7), %v2937_v0 }
  0x43   : > { %293 = vst [vmem:[#allocation2 + $0x70] sm:$0xff] (!%p2749_p7), %v2937_v0  ;;  %294 = vst [vmem:[#allocation2 + $0x78] sm:$0xff] (!%p2749_p7), %v2937_v0 }
  0x44   : > { %295 = vst [vmem:[#allocation2 + $0x80] sm:$0xff] (!%p2749_p7), %v2937_v0  ;;  %296 = vst [vmem:[#allocation2 + $0x88] sm:$0xff] (!%p2749_p7), %v2937_v0 }
  0x45   : > { %297 = vst [vmem:[#allocation2 + $0x90] sm:$0xff] (!%p2749_p7), %v2937_v0  ;;  %298 = vst [vmem:[#allocation2 + $0x98] sm:$0xff] (!%p2749_p7), %v2937_v0 }
  0x46   : > { %299 = vst [vmem:[#allocation2 + $0xa0] sm:$0xff] %v2937_v0  ;;  %300 = vst [vmem:[#allocation2 + $0xa8] sm:$0xff] %v2937_v0 }
  0x47   : > { %301 = vst [vmem:[#allocation2 + $0xb0] sm:$0xff] %v2937_v0  ;;  %302 = vst [vmem:[#allocation2 + $0xb8] sm:$0xff] %v2937_v0 }
  0x48   : > { %303 = vst [vmem:[#allocation2 + $0xc0] sm:$0xff] %v2937_v0  ;;  %304 = vst [vmem:[#allocation2 + $0xc8] sm:$0xff] %v2937_v0 }
  0x49   : > { %305 = vst [vmem:[#allocation2 + $0xd0] sm:$0xff] %v2937_v0  ;;  %306 = vst [vmem:[#allocation2 + $0xd8] sm:$0xff] %v2937_v0 }
  0x4a PF: > { %v308_v1 = vld [vmem:[%s3068_s29 + $0x8] sm:$0xff]  ;;  %v310_v2 = vld [vmem:[%s3068_s29 + $0x18] sm:$0xff]  ;;  %v307_v3 = vld [vmem:[%s3068_s29] sm:$0xff]  ;;  %p2752_p6 = scmp.ne.s32.totalorder %s2916_s15, 2 }
  0x4b   : > { %v532_v4 = vunpack.c.l.s8.bf16 %v308_v1  ;;  %v560_v5 = vunpack.c.h.s8.bf16 %v308_v1  ;;  %v534_v6 = vunpack.c.l.s8.bf16 %v310_v2  ;;  %v562_v7 = vunpack.c.h.s8.bf16 %v310_v2  ;;  %v309_v8 = vld [vmem:[%s3068_s29 + $0x10] sm:$0xff]  ;;  %v336_v11 = vld [vmem:[%s3068_s29 + $0xe8] sm:$0xff]  ;;  %v338_v12 = vld [vmem:[%s3068_s29 + $0xf8] sm:$0xff] }
  0x4c   : > { %v531_v9 = vunpack.c.l.s8.bf16 %v307_v3  ;;  %v533_v10 = vunpack.c.l.s8.bf16 %v309_v8  ;;  %v559_v13 = vunpack.c.h.s8.bf16 %v307_v3  ;;  %v561_v14 = vunpack.c.h.s8.bf16 %v309_v8  ;;  %v335_v17 = vld [vmem:[%s3068_s29 + $0xe0] sm:$0xff]  ;;  %v337_v18 = vld [vmem:[%s3068_s29 + $0xf0] sm:$0xff]  ;;  %v364_v23 = vld [vmem:[%s3068_s29 + $0x1c8] sm:$0xff] }
  0x4d   : > { %1015 = vmatprep.subr.bf16.mxu0 %v532_v4  ;;  %1056 = vmatprep.subr.bf16.mxu1 %v534_v6  ;;  %v588_v15 = vunpack.c.l.s8.bf16 %v336_v11  ;;  %v590_v16 = vunpack.c.l.s8.bf16 %v338_v12  ;;  %v587_v19 = vunpack.c.l.s8.bf16 %v335_v17  ;;  %v589_v20 = vunpack.c.l.s8.bf16 %v337_v18  ;;  %v366_v24 = vld [vmem:[%s3068_s29 + $0x1d8] sm:$0xff]  ;;  %v363_v29 = vld [vmem:[%s3068_s29 + $0x1c0] sm:$0xff]  ;;  %v365_v30 = vld [vmem:[%s3068_s29 + $0x1d0] sm:$0xff] }
  0x4e   : > { %1016 = vmatpush1.bf16.msra.mxu0 %v531_v9  ;;  %1057 = vmatpush1.bf16.msra.mxu1 %v533_v10  ;;  %v616_v21 = vunpack.c.h.s8.bf16 %v336_v11  ;;  %v618_v22 = vunpack.c.h.s8.bf16 %v338_v12  ;;  %v615_v25 = vunpack.c.h.s8.bf16 %v335_v17  ;;  %v617_v26 = vunpack.c.h.s8.bf16 %v337_v18  ;;  %v3106_v31 = vld [vmem:[%s3085_s25] sm:$0xff]  ;;  %v392_v37 = vld [vmem:[%s3068_s29 + $0x2a8] sm:$0xff]  ;;  %v394_v38 = vld [vmem:[%s3068_s29 + $0x2b8] sm:$0xff] }
  0x4f   : > { %1017 = vmatprep.subr.bf16.mxu0 %v560_v5  ;;  %1058 = vmatprep.subr.bf16.mxu1 %v562_v7  ;;  %v644_v27 = vunpack.c.l.s8.bf16 %v364_v23  ;;  %v646_v28 = vunpack.c.l.s8.bf16 %v366_v24  ;;  %v643_v32 = vunpack.c.l.s8.bf16 %v363_v29  ;;  %v645_v33 = vunpack.c.l.s8.bf16 %v365_v30  ;;  %v391_v43 = vld [vmem:[%s3068_s29 + $0x2a0] sm:$0xff]  ;;  %v393_v44 = vld [vmem:[%s3068_s29 + $0x2b0] sm:$0xff]  ;;  %v420_v49 = vld [vmem:[%s3068_s29 + $0x388] sm:$0xff] }
  0x50   : > { %v672_v34 = vunpack.c.h.s8.bf16 %v364_v23  ;;  %v674_v35 = vunpack.c.h.s8.bf16 %v366_v24  ;;  %v3110_v36 = vcombine.high %v3106_v31, %v3106_v31  ;;  %v671_v39 = vunpack.c.h.s8.bf16 %v363_v29  ;;  %v422_v50 = vld [vmem:[%s3068_s29 + $0x398] sm:$0xff]  ;;  %v419_v55 = vld [vmem:[%s3068_s29 + $0x380] sm:$0xff]  ;;  %v421_v56 = vld [vmem:[%s3068_s29 + $0x390] sm:$0xff] }
  0x51   : > { %v673_v40 = vunpack.c.h.s8.bf16 %v365_v30  ;;  %v700_v41 = vunpack.c.l.s8.bf16 %v392_v37  ;;  %v702_v42 = vunpack.c.l.s8.bf16 %v394_v38  ;;  %v699_v45 = vunpack.c.l.s8.bf16 %v391_v43  ;;  %v448_v61 = vld [vmem:[%s3068_s29 + $0x468] sm:$0xff]  ;;  %v450_v62 = vld [vmem:[%s3068_s29 + $0x478] sm:$0xff]  ;;  %v447_v3 = vld [vmem:[%s3068_s29 + $0x460] sm:$0xff] }
  0x52   : > { %1018 = vmatpush1.bf16.msra.mxu0 %v559_v13  ;;  %1059 = vmatpush1.bf16.msra.mxu1 %v561_v14  ;;  %v701_v46 = vunpack.c.l.s8.bf16 %v393_v44  ;;  %v728_v47 = vunpack.c.h.s8.bf16 %v392_v37  ;;  %v730_v48 = vunpack.c.h.s8.bf16 %v394_v38  ;;  %v727_v51 = vunpack.c.h.s8.bf16 %v391_v43  ;;  %v449_v4 = vld [vmem:[%s3068_s29 + $0x470] sm:$0xff]  ;;  %v476_v9 = vld [vmem:[%s3068_s29 + $0x548] sm:$0xff]  ;;  %v478_v10 = vld [vmem:[%s3068_s29 + $0x558] sm:$0xff] }
  0x53   : > { %1019 = vmatprep.subr.bf16.mxu0 %v588_v15  ;;  %1060 = vmatprep.subr.bf16.mxu1 %v590_v16  ;;  %v729_v52 = vunpack.c.h.s8.bf16 %v393_v44  ;;  %v756_v53 = vunpack.c.l.s8.bf16 %v420_v49  ;;  %v758_v54 = vunpack.c.l.s8.bf16 %v422_v50  ;;  %v755_v57 = vunpack.c.l.s8.bf16 %v419_v55  ;;  %v475_v15 = vld [vmem:[%s3068_s29 + $0x540] sm:$0xff]  ;;  %v477_v16 = vld [vmem:[%s3068_s29 + $0x550] sm:$0xff] }
  0x54   : > { %1047 = vmatprep.mubr.bf16.mxu0 %v3110_v36  ;;  %1088 = vmatprep.mubr.bf16.mxu1 %v3110_v36  ;;  %v757_v58 = vunpack.c.l.s8.bf16 %v421_v56  ;;  %v784_v59 = vunpack.c.h.s8.bf16 %v420_v49  ;;  %v786_v60 = vunpack.c.h.s8.bf16 %v422_v50  ;;  %v783_v63 = vunpack.c.h.s8.bf16 %v419_v55  ;;  %v342_v49 = vld [vmem:[%s3068_s29 + $0x118] sm:$0xff] }
  0x55   : > { %v785_v0 = vunpack.c.h.s8.bf16 %v421_v56  ;;  %v812_v1 = vunpack.c.l.s8.bf16 %v448_v61  ;;  %v814_v2 = vunpack.c.l.s8.bf16 %v450_v62  ;;  %v811_v5 = vunpack.c.l.s8.bf16 %v447_v3 }
  0x56   : > { %1020 = vmatpush1.bf16.msra.mxu0 %v587_v19  ;;  %1061 = vmatpush1.bf16.msra.mxu1 %v589_v20  ;;  %v813_v6 = vunpack.c.l.s8.bf16 %v449_v4  ;;  %v840_v7 = vunpack.c.h.s8.bf16 %v448_v61  ;;  %v842_v8 = vunpack.c.h.s8.bf16 %v450_v62  ;;  %v839_v11 = vunpack.c.h.s8.bf16 %v447_v3 }
  0x57   : > { %1021 = vmatprep.subr.bf16.mxu0 %v616_v21  ;;  %1062 = vmatprep.subr.bf16.mxu1 %v618_v22  ;;  %v841_v12 = vunpack.c.h.s8.bf16 %v449_v4  ;;  %v868_v13 = vunpack.c.l.s8.bf16 %v476_v9  ;;  %v870_v14 = vunpack.c.l.s8.bf16 %v478_v10  ;;  %v867_v17 = vunpack.c.l.s8.bf16 %v475_v15  ;;  %v504_v21 = vld [vmem:[%s3068_s29 + $0x628] sm:$0xff]  ;;  %v506_v22 = vld [vmem:[%s3068_s29 + $0x638] sm:$0xff] }
  0x58   : > { %v869_v18 = vunpack.c.l.s8.bf16 %v477_v16  ;;  %v896_v19 = vunpack.c.h.s8.bf16 %v476_v9  ;;  %v898_v20 = vunpack.c.h.s8.bf16 %v478_v10  ;;  %v895_v23 = vunpack.c.h.s8.bf16 %v475_v15 }
  0x59   : > { %v897_v24 = vunpack.c.h.s8.bf16 %v477_v16  ;;  %v3140_v43 = vcombine.low %v3106_v31, %v3106_v31  ;;  %vm2578_vm0 = vcmask (!%p2752_p6), 7168   ;;  %vm2585_vm1 = vcmask (!%p2752_p6), 15368  }
  0x5a   : > { %1022 = vmatpush1.bf16.msra.mxu0 %v615_v25  ;;  %1063 = vmatpush1.bf16.msra.mxu1 %v617_v26  ;;  %v924_v25 = vunpack.c.l.s8.bf16 %v504_v21  ;;  %v926_v26 = vunpack.c.l.s8.bf16 %v506_v22  ;;  %vm2592_vm2 = vcmask (!%p2752_p6), 23568   ;;  %vm2599_vm3 = vcmask (!%p2752_p6), 31768  }
  0x5b   : > { %1023 = vmatprep.subr.bf16.mxu0 %v644_v27  ;;  %1064 = vmatprep.subr.bf16.mxu1 %v646_v28  ;;  %v503_v27 = vld [vmem:[%s3068_s29 + $0x620] sm:$0xff]  ;;  %v505_v28 = vld [vmem:[%s3068_s29 + $0x630] sm:$0xff]  ;;  %vm2606_vm4 = vcmask (!%p2752_p6), 39968   ;;  %vm2613_vm5 = vcmask (!%p2752_p6), 48168   ;;  %vm2620_vm6 = vcmask (!%p2752_p6), 56368  }
  0x5c   : > { %v923_v29 = vunpack.c.l.s8.bf16 %v503_v27  ;;  %v925_v30 = vunpack.c.l.s8.bf16 %v505_v28  ;;  %v951_v37 = vunpack.c.h.s8.bf16 %v503_v27  ;;  %v953_v38 = vunpack.c.h.s8.bf16 %v505_v28 }
  0x5e   : > { %1024 = vmatpush1.bf16.msra.mxu0 %v643_v32  ;;  %1065 = vmatpush1.bf16.msra.mxu1 %v645_v33  ;;  %v952_v32 = vunpack.c.h.s8.bf16 %v504_v21  ;;  %v954_v33 = vunpack.c.h.s8.bf16 %v506_v22 }
  0x5f   : > { %1025 = vmatprep.subr.bf16.mxu0 %v672_v34  ;;  %1066 = vmatprep.subr.bf16.mxu1 %v674_v35  ;;  %v312_v34 = vld [vmem:[%s3068_s29 + $0x28] sm:$0xff]  ;;  %v314_v35 = vld [vmem:[%s3068_s29 + $0x38] sm:$0xff] }
  0x62   : > { %1026 = vmatpush1.bf16.msra.mxu0 %v671_v39  ;;  %1067 = vmatpush1.bf16.msra.mxu1 %v673_v40  ;;  %v536_v39 = vunpack.c.l.s8.bf16 %v312_v34  ;;  %v538_v40 = vunpack.c.l.s8.bf16 %v314_v35 }
  0x63   : > { %1027 = vmatprep.subr.bf16.mxu0 %v700_v41  ;;  %1068 = vmatprep.subr.bf16.mxu1 %v702_v42  ;;  %v311_v41 = vld [vmem:[%s3068_s29 + $0x20] sm:$0xff]  ;;  %v313_v42 = vld [vmem:[%s3068_s29 + $0x30] sm:$0xff] }
  0x64   : > { %v535_v44 = vunpack.c.l.s8.bf16 %v311_v41  ;;  %v563_v31 = vunpack.c.h.s8.bf16 %v311_v41  ;;  %v565_v50 = vunpack.c.h.s8.bf16 %v313_v42 }
  0x66   : > { %1028 = vmatpush1.bf16.msra.mxu0 %v699_v45  ;;  %1069 = vmatpush1.bf16.msra.mxu1 %v701_v46  ;;  %v537_v45 = vunpack.c.l.s8.bf16 %v313_v42  ;;  %v564_v46 = vunpack.c.h.s8.bf16 %v312_v34 }
  0x67   : > { %1029 = vmatprep.subr.bf16.mxu0 %v728_v47  ;;  %1070 = vmatprep.subr.bf16.mxu1 %v730_v48  ;;  %v566_v47 = vunpack.c.h.s8.bf16 %v314_v35  ;;  %v340_v48 = vld [vmem:[%s3068_s29 + $0x108] sm:$0xff] }
  0x6a   : > { %1030 = vmatpush1.bf16.msra.mxu0 %v727_v51  ;;  %1071 = vmatpush1.bf16.msra.mxu1 %v729_v52  ;;  %v592_v51 = vunpack.c.l.s8.bf16 %v340_v48  ;;  %v594_v52 = vunpack.c.l.s8.bf16 %v342_v49 }
  0x6b   : > { %1031 = vmatprep.subr.bf16.mxu0 %v756_v53  ;;  %1072 = vmatprep.subr.bf16.mxu1 %v758_v54  ;;  %v339_v53 = vld [vmem:[%s3068_s29 + $0x100] sm:$0xff]  ;;  %v341_v54 = vld [vmem:[%s3068_s29 + $0x110] sm:$0xff] }
  0x6c   : > { %v591_v55 = vunpack.c.l.s8.bf16 %v339_v53  ;;  %v593_v56 = vunpack.c.l.s8.bf16 %v341_v54  ;;  %v619_v61 = vunpack.c.h.s8.bf16 %v339_v53  ;;  %v621_v62 = vunpack.c.h.s8.bf16 %v341_v54 }
  0x6e   : > { %1032 = vmatpush1.bf16.msra.mxu0 %v755_v57  ;;  %1073 = vmatpush1.bf16.msra.mxu1 %v757_v58  ;;  %v620_v57 = vunpack.c.h.s8.bf16 %v340_v48  ;;  %v622_v58 = vunpack.c.h.s8.bf16 %v342_v49 }
  0x6f   : > { %1033 = vmatprep.subr.bf16.mxu0 %v784_v59  ;;  %1074 = vmatprep.subr.bf16.mxu1 %v786_v60  ;;  %v368_v59 = vld [vmem:[%s3068_s29 + $0x1e8] sm:$0xff]  ;;  %v370_v60 = vld [vmem:[%s3068_s29 + $0x1f8] sm:$0xff] }
  0x72   : > { %1034 = vmatpush1.bf16.msra.mxu0 %v783_v63  ;;  %1075 = vmatpush1.bf16.msra.mxu1 %v785_v0  ;;  %v648_v63 = vunpack.c.l.s8.bf16 %v368_v59  ;;  %v650_v0 = vunpack.c.l.s8.bf16 %v370_v60 }
  0x73   : > { %1035 = vmatprep.subr.bf16.mxu0 %v812_v1  ;;  %1076 = vmatprep.subr.bf16.mxu1 %v814_v2  ;;  %v367_v1 = vld [vmem:[%s3068_s29 + $0x1e0] sm:$0xff]  ;;  %v369_v2 = vld [vmem:[%s3068_s29 + $0x1f0] sm:$0xff] }
  0x74   : > { %v647_v3 = vunpack.c.l.s8.bf16 %v367_v1  ;;  %v649_v4 = vunpack.c.l.s8.bf16 %v369_v2  ;;  %v675_v9 = vunpack.c.h.s8.bf16 %v367_v1  ;;  %v677_v10 = vunpack.c.h.s8.bf16 %v369_v2 }
  0x76   : > { %1036 = vmatpush1.bf16.msra.mxu0 %v811_v5  ;;  %1077 = vmatpush1.bf16.msra.mxu1 %v813_v6  ;;  %v676_v5 = vunpack.c.h.s8.bf16 %v368_v59  ;;  %v678_v6 = vunpack.c.h.s8.bf16 %v370_v60 }
  0x77   : > { %1037 = vmatprep.subr.bf16.mxu0 %v840_v7  ;;  %1078 = vmatprep.subr.bf16.mxu1 %v842_v8  ;;  %v396_v7 = vld [vmem:[%s3068_s29 + $0x2c8] sm:$0xff]  ;;  %v398_v8 = vld [vmem:[%s3068_s29 + $0x2d8] sm:$0xff] }
  0x7a   : > { %1038 = vmatpush1.bf16.msra.mxu0 %v839_v11  ;;  %1079 = vmatpush1.bf16.msra.mxu1 %v841_v12  ;;  %v704_v11 = vunpack.c.l.s8.bf16 %v396_v7  ;;  %v706_v12 = vunpack.c.l.s8.bf16 %v398_v8 }
  0x7b   : > { %1039 = vmatprep.subr.bf16.mxu0 %v868_v13  ;;  %1080 = vmatprep.subr.bf16.mxu1 %v870_v14  ;;  %v395_v13 = vld [vmem:[%s3068_s29 + $0x2c0] sm:$0xff]  ;;  %v397_v14 = vld [vmem:[%s3068_s29 + $0x2d0] sm:$0xff] }
  0x7c   : > { %v703_v15 = vunpack.c.l.s8.bf16 %v395_v13  ;;  %v705_v16 = vunpack.c.l.s8.bf16 %v397_v14  ;;  %v731_v21 = vunpack.c.h.s8.bf16 %v395_v13  ;;  %v733_v22 = vunpack.c.h.s8.bf16 %v397_v14 }
  0x7e   : > { %1040 = vmatpush1.bf16.msra.mxu0 %v867_v17  ;;  %1081 = vmatpush1.bf16.msra.mxu1 %v869_v18  ;;  %v732_v17 = vunpack.c.h.s8.bf16 %v396_v7  ;;  %v734_v18 = vunpack.c.h.s8.bf16 %v398_v8 }
  0x7f   : > { %1041 = vmatprep.subr.bf16.mxu0 %v896_v19  ;;  %1082 = vmatprep.subr.bf16.mxu1 %v898_v20  ;;  %v424_v19 = vld [vmem:[%s3068_s29 + $0x3a8] sm:$0xff]  ;;  %v426_v20 = vld [vmem:[%s3068_s29 + $0x3b8] sm:$0xff] }
  0x82   : > { %1042 = vmatpush1.bf16.msra.mxu0 %v895_v23  ;;  %1083 = vmatpush1.bf16.msra.mxu1 %v897_v24  ;;  %v760_v23 = vunpack.c.l.s8.bf16 %v424_v19  ;;  %v762_v24 = vunpack.c.l.s8.bf16 %v426_v20 }
  0x83   : > { %1043 = vmatprep.subr.bf16.mxu0 %v924_v25  ;;  %1084 = vmatprep.subr.bf16.mxu1 %v926_v26  ;;  %v423_v25 = vld [vmem:[%s3068_s29 + $0x3a0] sm:$0xff]  ;;  %v425_v26 = vld [vmem:[%s3068_s29 + $0x3b0] sm:$0xff] }
  0x84   : > { %v759_v27 = vunpack.c.l.s8.bf16 %v423_v25  ;;  %v761_v28 = vunpack.c.l.s8.bf16 %v425_v26  ;;  %v787_v34 = vunpack.c.h.s8.bf16 %v423_v25  ;;  %v789_v35 = vunpack.c.h.s8.bf16 %v425_v26 }
  0x86   : > { %1044 = vmatpush1.bf16.msra.mxu0 %v923_v29  ;;  %1085 = vmatpush1.bf16.msra.mxu1 %v925_v30  ;;  %v788_v29 = vunpack.c.h.s8.bf16 %v424_v19  ;;  %v790_v30 = vunpack.c.h.s8.bf16 %v426_v20 }
  0x87   : > { %1045 = vmatprep.subr.bf16.mxu0 %v952_v32  ;;  %1086 = vmatprep.subr.bf16.mxu1 %v954_v33  ;;  %v452_v32 = vld [vmem:[%s3068_s29 + $0x488] sm:$0xff]  ;;  %v454_v33 = vld [vmem:[%s3068_s29 + $0x498] sm:$0xff] }
  0x8a   : > { %1046 = vmatpush1.bf16.msra.mxu0 %v951_v37  ;;  %1087 = vmatpush1.bf16.msra.mxu1 %v953_v38  ;;  %v816_v37 = vunpack.c.l.s8.bf16 %v452_v32  ;;  %v818_v38 = vunpack.c.l.s8.bf16 %v454_v33 }
  0x8b   : > { %1097 = vmatprep.subr.bf16.mxu0 %v536_v39  ;;  %1138 = vmatprep.subr.bf16.mxu1 %v538_v40  ;;  %v451_v39 = vld [vmem:[%s3068_s29 + $0x480] sm:$0xff]  ;;  %v453_v40 = vld [vmem:[%s3068_s29 + $0x490] sm:$0xff] }
  0x8c   : > { %v815_v41 = vunpack.c.l.s8.bf16 %v451_v39  ;;  %v817_v42 = vunpack.c.l.s8.bf16 %v453_v40  ;;  %v843_v48 = vunpack.c.h.s8.bf16 %v451_v39  ;;  %v845_v49 = vunpack.c.h.s8.bf16 %v453_v40 }
  0x8d   : > { %1048 = vmatmul.mubr.bf16.vlgmr.msra.gmra.mrb[0].mxu0 %v3140_v43  ;;  %1089 = vmatmul.mubr.bf16.vlgmr.msra.gmra.mrb[0].mxu1 %v3140_v43 }
  0x8e   : > { %1098 = vmatpush1.bf16.msra.mxu0 %v535_v44  ;;  %1139 = vmatpush1.bf16.msra.mxu1 %v537_v45  ;;  %v844_v44 = vunpack.c.h.s8.bf16 %v452_v32  ;;  %v846_v45 = vunpack.c.h.s8.bf16 %v454_v33 }
  0x8f   : > { %1099 = vmatprep.subr.bf16.mxu0 %v564_v46  ;;  %1140 = vmatprep.subr.bf16.mxu1 %v566_v47  ;;  %v480_v46 = vld [vmem:[%s3068_s29 + $0x568] sm:$0xff]  ;;  %v482_v47 = vld [vmem:[%s3068_s29 + $0x578] sm:$0xff] }
  0x90   : > { %1129 = vmatprep.mubr.bf16.mxu0 %v3110_v36  ;;  %1170 = vmatprep.mubr.bf16.mxu1 %v3110_v36 }
  0x92   : > { %1100 = vmatpush1.bf16.msra.mxu0 %v563_v31  ;;  %1141 = vmatpush1.bf16.msra.mxu1 %v565_v50  ;;  %v872_v31 = vunpack.c.l.s8.bf16 %v480_v46  ;;  %v874_v50 = vunpack.c.l.s8.bf16 %v482_v47 }
  0x93   : > { %1101 = vmatprep.subr.bf16.mxu0 %v592_v51  ;;  %1142 = vmatprep.subr.bf16.mxu1 %v594_v52  ;;  %v479_v51 = vld [vmem:[%s3068_s29 + $0x560] sm:$0xff]  ;;  %v481_v52 = vld [vmem:[%s3068_s29 + $0x570] sm:$0xff] }
  0x94   : > { %v871_v53 = vunpack.c.l.s8.bf16 %v479_v51  ;;  %v873_v54 = vunpack.c.l.s8.bf16 %v481_v52  ;;  %v899_v59 = vunpack.c.h.s8.bf16 %v479_v51  ;;  %v901_v60 = vunpack.c.h.s8.bf16 %v481_v52 }
  0x96   : > { %1102 = vmatpush1.bf16.msra.mxu0 %v591_v55  ;;  %1143 = vmatpush1.bf16.msra.mxu1 %v593_v56  ;;  %v900_v55 = vunpack.c.h.s8.bf16 %v480_v46  ;;  %v902_v56 = vunpack.c.h.s8.bf16 %v482_v47 }
  0x97   : > { %1103 = vmatprep.subr.bf16.mxu0 %v620_v57  ;;  %1144 = vmatprep.subr.bf16.mxu1 %v622_v58  ;;  %v508_v57 = vld [vmem:[%s3068_s29 + $0x648] sm:$0xff]  ;;  %v510_v58 = vld [vmem:[%s3068_s29 + $0x658] sm:$0xff] }
  0x9a   : > { %1104 = vmatpush1.bf16.msra.mxu0 %v619_v61  ;;  %1145 = vmatpush1.bf16.msra.mxu1 %v621_v62  ;;  %v928_v61 = vunpack.c.l.s8.bf16 %v508_v57  ;;  %v930_v62 = vunpack.c.l.s8.bf16 %v510_v58 }
  0x9b   : > { %1105 = vmatprep.subr.bf16.mxu0 %v648_v63  ;;  %1146 = vmatprep.subr.bf16.mxu1 %v650_v0  ;;  %v507_v63 = vld [vmem:[%s3068_s29 + $0x640] sm:$0xff]  ;;  %v509_v0 = vld [vmem:[%s3068_s29 + $0x650] sm:$0xff] }
  0x9c   : > { %v927_v1 = vunpack.c.l.s8.bf16 %v507_v63  ;;  %v929_v2 = vunpack.c.l.s8.bf16 %v509_v0  ;;  %v955_v7 = vunpack.c.h.s8.bf16 %v507_v63  ;;  %v957_v8 = vunpack.c.h.s8.bf16 %v509_v0 }
  0x9e   : > { %1106 = vmatpush1.bf16.msra.mxu0 %v647_v3  ;;  %1147 = vmatpush1.bf16.msra.mxu1 %v649_v4  ;;  %v956_v3 = vunpack.c.h.s8.bf16 %v508_v57  ;;  %v958_v4 = vunpack.c.h.s8.bf16 %v510_v58 }
  0x9f   : > { %1107 = vmatprep.subr.bf16.mxu0 %v676_v5  ;;  %1148 = vmatprep.subr.bf16.mxu1 %v678_v6  ;;  %v316_v5 = vld [vmem:[%s3068_s29 + $0x48] sm:$0xff]  ;;  %v318_v6 = vld [vmem:[%s3068_s29 + $0x58] sm:$0xff] }
  0xa2   : > { %1108 = vmatpush1.bf16.msra.mxu0 %v675_v9  ;;  %1149 = vmatpush1.bf16.msra.mxu1 %v677_v10  ;;  %v540_v9 = vunpack.c.l.s8.bf16 %v316_v5  ;;  %v542_v10 = vunpack.c.l.s8.bf16 %v318_v6 }
  0xa3   : > { %1109 = vmatprep.subr.bf16.mxu0 %v704_v11  ;;  %1150 = vmatprep.subr.bf16.mxu1 %v706_v12  ;;  %v315_v11 = vld [vmem:[%s3068_s29 + $0x40] sm:$0xff]  ;;  %v317_v12 = vld [vmem:[%s3068_s29 + $0x50] sm:$0xff] }
  0xa4   : > { %v539_v13 = vunpack.c.l.s8.bf16 %v315_v11  ;;  %v541_v14 = vunpack.c.l.s8.bf16 %v317_v12  ;;  %v567_v19 = vunpack.c.h.s8.bf16 %v315_v11  ;;  %v569_v20 = vunpack.c.h.s8.bf16 %v317_v12 }
  0xa6   : > { %1110 = vmatpush1.bf16.msra.mxu0 %v703_v15  ;;  %1151 = vmatpush1.bf16.msra.mxu1 %v705_v16  ;;  %v568_v15 = vunpack.c.h.s8.bf16 %v316_v5  ;;  %v570_v16 = vunpack.c.h.s8.bf16 %v318_v6 }
  0xa7   : > { %1111 = vmatprep.subr.bf16.mxu0 %v732_v17  ;;  %1152 = vmatprep.subr.bf16.mxu1 %v734_v18  ;;  %v344_v17 = vld [vmem:[%s3068_s29 + $0x128] sm:$0xff]  ;;  %v346_v18 = vld [vmem:[%s3068_s29 + $0x138] sm:$0xff] }
  0xaa   : > { %1112 = vmatpush1.bf16.msra.mxu0 %v731_v21  ;;  %1153 = vmatpush1.bf16.msra.mxu1 %v733_v22  ;;  %v596_v21 = vunpack.c.l.s8.bf16 %v344_v17  ;;  %v598_v22 = vunpack.c.l.s8.bf16 %v346_v18 }
  0xab   : > { %1113 = vmatprep.subr.bf16.mxu0 %v760_v23  ;;  %1154 = vmatprep.subr.bf16.mxu1 %v762_v24  ;;  %v343_v23 = vld [vmem:[%s3068_s29 + $0x120] sm:$0xff]  ;;  %v345_v24 = vld [vmem:[%s3068_s29 + $0x130] sm:$0xff] }
  0xac   : > { %v595_v25 = vunpack.c.l.s8.bf16 %v343_v23  ;;  %v597_v26 = vunpack.c.l.s8.bf16 %v345_v24  ;;  %v623_v32 = vunpack.c.h.s8.bf16 %v343_v23  ;;  %v625_v33 = vunpack.c.h.s8.bf16 %v345_v24 }
  0xae   : > { %1114 = vmatpush1.bf16.msra.mxu0 %v759_v27  ;;  %1155 = vmatpush1.bf16.msra.mxu1 %v761_v28  ;;  %v624_v27 = vunpack.c.h.s8.bf16 %v344_v17  ;;  %v626_v28 = vunpack.c.h.s8.bf16 %v346_v18 }
  0xaf   : > { %1115 = vmatprep.subr.bf16.mxu0 %v788_v29  ;;  %1156 = vmatprep.subr.bf16.mxu1 %v790_v30  ;;  %v372_v29 = vld [vmem:[%s3068_s29 + $0x208] sm:$0xff]  ;;  %v374_v30 = vld [vmem:[%s3068_s29 + $0x218] sm:$0xff] }
  0xb2   : > { %1116 = vmatpush1.bf16.msra.mxu0 %v787_v34  ;;  %1157 = vmatpush1.bf16.msra.mxu1 %v789_v35  ;;  %v652_v34 = vunpack.c.l.s8.bf16 %v372_v29  ;;  %v654_v35 = vunpack.c.l.s8.bf16 %v374_v30 }
  0xb3   : > { %1117 = vmatprep.subr.bf16.mxu0 %v816_v37  ;;  %1158 = vmatprep.subr.bf16.mxu1 %v818_v38  ;;  %v371_v37 = vld [vmem:[%s3068_s29 + $0x200] sm:$0xff]  ;;  %v373_v38 = vld [vmem:[%s3068_s29 + $0x210] sm:$0xff] }
  0xb4   : > { %v651_v39 = vunpack.c.l.s8.bf16 %v371_v37  ;;  %v653_v40 = vunpack.c.l.s8.bf16 %v373_v38  ;;  %v679_v46 = vunpack.c.h.s8.bf16 %v371_v37  ;;  %v681_v47 = vunpack.c.h.s8.bf16 %v373_v38 }
  0xb6   : > { %1118 = vmatpush1.bf16.msra.mxu0 %v815_v41  ;;  %1159 = vmatpush1.bf16.msra.mxu1 %v817_v42  ;;  %v680_v41 = vunpack.c.h.s8.bf16 %v372_v29  ;;  %v682_v42 = vunpack.c.h.s8.bf16 %v374_v30 }
  0xb7   : > { %1119 = vmatprep.subr.bf16.mxu0 %v844_v44  ;;  %1160 = vmatprep.subr.bf16.mxu1 %v846_v45  ;;  %v400_v44 = vld [vmem:[%s3068_s29 + $0x2e8] sm:$0xff]  ;;  %v402_v45 = vld [vmem:[%s3068_s29 + $0x2f8] sm:$0xff] }
  0xba   : > { %1120 = vmatpush1.bf16.msra.mxu0 %v843_v48  ;;  %1161 = vmatpush1.bf16.msra.mxu1 %v845_v49  ;;  %v708_v48 = vunpack.c.l.s8.bf16 %v400_v44  ;;  %v710_v49 = vunpack.c.l.s8.bf16 %v402_v45 }
  0xbb   : > { %1121 = vmatprep.subr.bf16.mxu0 %v872_v31  ;;  %1162 = vmatprep.subr.bf16.mxu1 %v874_v50  ;;  %v399_v31 = vld [vmem:[%s3068_s29 + $0x2e0] sm:$0xff]  ;;  %v401_v50 = vld [vmem:[%s3068_s29 + $0x2f0] sm:$0xff] }
  0xbc   : > { %v707_v51 = vunpack.c.l.s8.bf16 %v399_v31  ;;  %v709_v52 = vunpack.c.l.s8.bf16 %v401_v50  ;;  %v735_v57 = vunpack.c.h.s8.bf16 %v399_v31  ;;  %v737_v58 = vunpack.c.h.s8.bf16 %v401_v50 }
  0xbe   : > { %1122 = vmatpush1.bf16.msra.mxu0 %v871_v53  ;;  %1163 = vmatpush1.bf16.msra.mxu1 %v873_v54  ;;  %v736_v53 = vunpack.c.h.s8.bf16 %v400_v44  ;;  %v738_v54 = vunpack.c.h.s8.bf16 %v402_v45 }
  0xbf   : > { %1123 = vmatprep.subr.bf16.mxu0 %v900_v55  ;;  %1164 = vmatprep.subr.bf16.mxu1 %v902_v56  ;;  %v428_v55 = vld [vmem:[%s3068_s29 + $0x3c8] sm:$0xff]  ;;  %v430_v56 = vld [vmem:[%s3068_s29 + $0x3d8] sm:$0xff] }
  0xc2   : > { %1124 = vmatpush1.bf16.msra.mxu0 %v899_v59  ;;  %1165 = vmatpush1.bf16.msra.mxu1 %v901_v60  ;;  %v764_v59 = vunpack.c.l.s8.bf16 %v428_v55  ;;  %v766_v60 = vunpack.c.l.s8.bf16 %v430_v56 }
  0xc3   : > { %1125 = vmatprep.subr.bf16.mxu0 %v928_v61  ;;  %1166 = vmatprep.subr.bf16.mxu1 %v930_v62  ;;  %v427_v61 = vld [vmem:[%s3068_s29 + $0x3c0] sm:$0xff]  ;;  %v429_v62 = vld [vmem:[%s3068_s29 + $0x3d0] sm:$0xff] }
  0xc4   : > { %v763_v63 = vunpack.c.l.s8.bf16 %v427_v61  ;;  %v765_v0 = vunpack.c.l.s8.bf16 %v429_v62  ;;  %v791_v5 = vunpack.c.h.s8.bf16 %v427_v61  ;;  %v793_v6 = vunpack.c.h.s8.bf16 %v429_v62 }
  0xc6   : > { %1126 = vmatpush1.bf16.msra.mxu0 %v927_v1  ;;  %1167 = vmatpush1.bf16.msra.mxu1 %v929_v2  ;;  %v792_v1 = vunpack.c.h.s8.bf16 %v428_v55  ;;  %v794_v2 = vunpack.c.h.s8.bf16 %v430_v56 }
  0xc7   : > { %1127 = vmatprep.subr.bf16.mxu0 %v956_v3  ;;  %1168 = vmatprep.subr.bf16.mxu1 %v958_v4  ;;  %v456_v3 = vld [vmem:[%s3068_s29 + $0x4a8] sm:$0xff]  ;;  %v458_v4 = vld [vmem:[%s3068_s29 + $0x4b8] sm:$0xff] }
  0xca   : > { %1128 = vmatpush1.bf16.msra.mxu0 %v955_v7  ;;  %1169 = vmatpush1.bf16.msra.mxu1 %v957_v8  ;;  %v820_v7 = vunpack.c.l.s8.bf16 %v456_v3  ;;  %v822_v8 = vunpack.c.l.s8.bf16 %v458_v4 }
  0xcb   : > { %1179 = vmatprep.subr.bf16.mxu0 %v540_v9  ;;  %1220 = vmatprep.subr.bf16.mxu1 %v542_v10  ;;  %v455_v9 = vld [vmem:[%s3068_s29 + $0x4a0] sm:$0xff]  ;;  %v457_v10 = vld [vmem:[%s3068_s29 + $0x4b0] sm:$0xff] }
  0xcc   : > { %v819_v11 = vunpack.c.l.s8.bf16 %v455_v9  ;;  %v821_v12 = vunpack.c.l.s8.bf16 %v457_v10  ;;  %v847_v17 = vunpack.c.h.s8.bf16 %v455_v9  ;;  %v849_v18 = vunpack.c.h.s8.bf16 %v457_v10 }
  0xcd   : > { %1130 = vmatmul.mubr.bf16.vlgmr.msra.gmra.mrb[4].mxu0 %v3140_v43  ;;  %1171 = vmatmul.mubr.bf16.vlgmr.msra.gmra.mrb[4].mxu1 %v3140_v43 }
  0xce   : > { %1180 = vmatpush1.bf16.msra.mxu0 %v539_v13  ;;  %1221 = vmatpush1.bf16.msra.mxu1 %v541_v14  ;;  %v848_v13 = vunpack.c.h.s8.bf16 %v456_v3  ;;  %v850_v14 = vunpack.c.h.s8.bf16 %v458_v4 }
  0xcf   : > { %1181 = vmatprep.subr.bf16.mxu0 %v568_v15  ;;  %1222 = vmatprep.subr.bf16.mxu1 %v570_v16  ;;  %v484_v15 = vld [vmem:[%s3068_s29 + $0x588] sm:$0xff]  ;;  %v486_v16 = vld [vmem:[%s3068_s29 + $0x598] sm:$0xff] }
  0xd0   : > { %1211 = vmatprep.mubr.bf16.mxu0 %v3110_v36  ;;  %1252 = vmatprep.mubr.bf16.mxu1 %v3110_v36 }
  0xd2   : > { %1182 = vmatpush1.bf16.msra.mxu0 %v567_v19  ;;  %1223 = vmatpush1.bf16.msra.mxu1 %v569_v20  ;;  %v876_v19 = vunpack.c.l.s8.bf16 %v484_v15  ;;  %v878_v20 = vunpack.c.l.s8.bf16 %v486_v16 }
  0xd3   : > { %1183 = vmatprep.subr.bf16.mxu0 %v596_v21  ;;  %1224 = vmatprep.subr.bf16.mxu1 %v598_v22  ;;  %v483_v21 = vld [vmem:[%s3068_s29 + $0x580] sm:$0xff]  ;;  %v485_v22 = vld [vmem:[%s3068_s29 + $0x590] sm:$0xff] }
  0xd4   : > { %v875_v23 = vunpack.c.l.s8.bf16 %v483_v21  ;;  %v877_v24 = vunpack.c.l.s8.bf16 %v485_v22  ;;  %v903_v29 = vunpack.c.h.s8.bf16 %v483_v21  ;;  %v905_v30 = vunpack.c.h.s8.bf16 %v485_v22 }
  0xd6   : > { %1184 = vmatpush1.bf16.msra.mxu0 %v595_v25  ;;  %1225 = vmatpush1.bf16.msra.mxu1 %v597_v26  ;;  %v904_v25 = vunpack.c.h.s8.bf16 %v484_v15  ;;  %v906_v26 = vunpack.c.h.s8.bf16 %v486_v16 }
  0xd7   : > { %1185 = vmatprep.subr.bf16.mxu0 %v624_v27  ;;  %1226 = vmatprep.subr.bf16.mxu1 %v626_v28  ;;  %v512_v27 = vld [vmem:[%s3068_s29 + $0x668] sm:$0xff]  ;;  %v514_v28 = vld [vmem:[%s3068_s29 + $0x678] sm:$0xff] }
  0xda   : > { %1186 = vmatpush1.bf16.msra.mxu0 %v623_v32  ;;  %1227 = vmatpush1.bf16.msra.mxu1 %v625_v33  ;;  %v932_v32 = vunpack.c.l.s8.bf16 %v512_v27  ;;  %v934_v33 = vunpack.c.l.s8.bf16 %v514_v28 }
  0xdb   : > { %1187 = vmatprep.subr.bf16.mxu0 %v652_v34  ;;  %1228 = vmatprep.subr.bf16.mxu1 %v654_v35  ;;  %v511_v34 = vld [vmem:[%s3068_s29 + $0x660] sm:$0xff]  ;;  %v513_v35 = vld [vmem:[%s3068_s29 + $0x670] sm:$0xff] }
  0xdc   : > { %v931_v37 = vunpack.c.l.s8.bf16 %v511_v34  ;;  %v933_v38 = vunpack.c.l.s8.bf16 %v513_v35  ;;  %v959_v44 = vunpack.c.h.s8.bf16 %v511_v34  ;;  %v961_v45 = vunpack.c.h.s8.bf16 %v513_v35 }
  0xde   : > { %1188 = vmatpush1.bf16.msra.mxu0 %v651_v39  ;;  %1229 = vmatpush1.bf16.msra.mxu1 %v653_v40  ;;  %v960_v39 = vunpack.c.h.s8.bf16 %v512_v27  ;;  %v962_v40 = vunpack.c.h.s8.bf16 %v514_v28 }
  0xdf   : > { %1189 = vmatprep.subr.bf16.mxu0 %v680_v41  ;;  %1230 = vmatprep.subr.bf16.mxu1 %v682_v42  ;;  %v320_v41 = vld [vmem:[%s3068_s29 + $0x68] sm:$0xff]  ;;  %v322_v42 = vld [vmem:[%s3068_s29 + $0x78] sm:$0xff] }
  0xe2   : > { %1190 = vmatpush1.bf16.msra.mxu0 %v679_v46  ;;  %1231 = vmatpush1.bf16.msra.mxu1 %v681_v47  ;;  %v544_v46 = vunpack.c.l.s8.bf16 %v320_v41  ;;  %v546_v47 = vunpack.c.l.s8.bf16 %v322_v42 }
  0xe3   : > { %1191 = vmatprep.subr.bf16.mxu0 %v708_v48  ;;  %1232 = vmatprep.subr.bf16.mxu1 %v710_v49  ;;  %v319_v48 = vld [vmem:[%s3068_s29 + $0x60] sm:$0xff]  ;;  %v321_v49 = vld [vmem:[%s3068_s29 + $0x70] sm:$0xff] }
  0xe4   : > { %v543_v31 = vunpack.c.l.s8.bf16 %v319_v48  ;;  %v545_v50 = vunpack.c.l.s8.bf16 %v321_v49  ;;  %v571_v55 = vunpack.c.h.s8.bf16 %v319_v48  ;;  %v573_v56 = vunpack.c.h.s8.bf16 %v321_v49 }
  0xe6   : > { %1192 = vmatpush1.bf16.msra.mxu0 %v707_v51  ;;  %1233 = vmatpush1.bf16.msra.mxu1 %v709_v52  ;;  %v572_v51 = vunpack.c.h.s8.bf16 %v320_v41  ;;  %v574_v52 = vunpack.c.h.s8.bf16 %v322_v42 }
  0xe7   : > { %1193 = vmatprep.subr.bf16.mxu0 %v736_v53  ;;  %1234 = vmatprep.subr.bf16.mxu1 %v738_v54  ;;  %v348_v53 = vld [vmem:[%s3068_s29 + $0x148] sm:$0xff]  ;;  %v350_v54 = vld [vmem:[%s3068_s29 + $0x158] sm:$0xff] }
  0xea   : > { %1194 = vmatpush1.bf16.msra.mxu0 %v735_v57  ;;  %1235 = vmatpush1.bf16.msra.mxu1 %v737_v58  ;;  %v600_v57 = vunpack.c.l.s8.bf16 %v348_v53  ;;  %v602_v58 = vunpack.c.l.s8.bf16 %v350_v54 }
  0xeb   : > { %1195 = vmatprep.subr.bf16.mxu0 %v764_v59  ;;  %1236 = vmatprep.subr.bf16.mxu1 %v766_v60  ;;  %v347_v59 = vld [vmem:[%s3068_s29 + $0x140] sm:$0xff]  ;;  %v349_v60 = vld [vmem:[%s3068_s29 + $0x150] sm:$0xff] }
  0xec   : > { %v599_v61 = vunpack.c.l.s8.bf16 %v347_v59  ;;  %v601_v62 = vunpack.c.l.s8.bf16 %v349_v60  ;;  %v627_v3 = vunpack.c.h.s8.bf16 %v347_v59  ;;  %v629_v4 = vunpack.c.h.s8.bf16 %v349_v60 }
  0xee   : > { %1196 = vmatpush1.bf16.msra.mxu0 %v763_v63  ;;  %1237 = vmatpush1.bf16.msra.mxu1 %v765_v0  ;;  %v628_v63 = vunpack.c.h.s8.bf16 %v348_v53  ;;  %v630_v0 = vunpack.c.h.s8.bf16 %v350_v54 }
  0xef   : > { %1197 = vmatprep.subr.bf16.mxu0 %v792_v1  ;;  %1238 = vmatprep.subr.bf16.mxu1 %v794_v2  ;;  %v376_v1 = vld [vmem:[%s3068_s29 + $0x228] sm:$0xff]  ;;  %v378_v2 = vld [vmem:[%s3068_s29 + $0x238] sm:$0xff] }
  0xf2   : > { %1198 = vmatpush1.bf16.msra.mxu0 %v791_v5  ;;  %1239 = vmatpush1.bf16.msra.mxu1 %v793_v6  ;;  %v656_v5 = vunpack.c.l.s8.bf16 %v376_v1  ;;  %v658_v6 = vunpack.c.l.s8.bf16 %v378_v2 }
  0xf3   : > { %1199 = vmatprep.subr.bf16.mxu0 %v820_v7  ;;  %1240 = vmatprep.subr.bf16.mxu1 %v822_v8  ;;  %v375_v7 = vld [vmem:[%s3068_s29 + $0x220] sm:$0xff]  ;;  %v377_v8 = vld [vmem:[%s3068_s29 + $0x230] sm:$0xff] }
  0xf4   : > { %v655_v9 = vunpack.c.l.s8.bf16 %v375_v7  ;;  %v657_v10 = vunpack.c.l.s8.bf16 %v377_v8  ;;  %v683_v15 = vunpack.c.h.s8.bf16 %v375_v7  ;;  %v685_v16 = vunpack.c.h.s8.bf16 %v377_v8 }
  0xf6   : > { %1200 = vmatpush1.bf16.msra.mxu0 %v819_v11  ;;  %1241 = vmatpush1.bf16.msra.mxu1 %v821_v12  ;;  %v684_v11 = vunpack.c.h.s8.bf16 %v376_v1  ;;  %v686_v12 = vunpack.c.h.s8.bf16 %v378_v2 }
  0xf7   : > { %1201 = vmatprep.subr.bf16.mxu0 %v848_v13  ;;  %1242 = vmatprep.subr.bf16.mxu1 %v850_v14  ;;  %v404_v13 = vld [vmem:[%s3068_s29 + $0x308] sm:$0xff]  ;;  %v406_v14 = vld [vmem:[%s3068_s29 + $0x318] sm:$0xff] }
  0xfa   : > { %1202 = vmatpush1.bf16.msra.mxu0 %v847_v17  ;;  %1243 = vmatpush1.bf16.msra.mxu1 %v849_v18  ;;  %v712_v17 = vunpack.c.l.s8.bf16 %v404_v13  ;;  %v714_v18 = vunpack.c.l.s8.bf16 %v406_v14 }
  0xfb   : > { %1203 = vmatprep.subr.bf16.mxu0 %v876_v19  ;;  %1244 = vmatprep.subr.bf16.mxu1 %v878_v20  ;;  %v403_v19 = vld [vmem:[%s3068_s29 + $0x300] sm:$0xff]  ;;  %v405_v20 = vld [vmem:[%s3068_s29 + $0x310] sm:$0xff] }
  0xfc   : > { %v711_v21 = vunpack.c.l.s8.bf16 %v403_v19  ;;  %v713_v22 = vunpack.c.l.s8.bf16 %v405_v20  ;;  %v739_v27 = vunpack.c.h.s8.bf16 %v403_v19  ;;  %v741_v28 = vunpack.c.h.s8.bf16 %v405_v20 }
  0xfe   : > { %1204 = vmatpush1.bf16.msra.mxu0 %v875_v23  ;;  %1245 = vmatpush1.bf16.msra.mxu1 %v877_v24  ;;  %v740_v23 = vunpack.c.h.s8.bf16 %v404_v13  ;;  %v742_v24 = vunpack.c.h.s8.bf16 %v406_v14 }
  0xff   : > { %1205 = vmatprep.subr.bf16.mxu0 %v904_v25  ;;  %1246 = vmatprep.subr.bf16.mxu1 %v906_v26  ;;  %v432_v25 = vld [vmem:[%s3068_s29 + $0x3e8] sm:$0xff]  ;;  %v434_v26 = vld [vmem:[%s3068_s29 + $0x3f8] sm:$0xff] }
 0x102   : > { %1206 = vmatpush1.bf16.msra.mxu0 %v903_v29  ;;  %1247 = vmatpush1.bf16.msra.mxu1 %v905_v30  ;;  %v768_v29 = vunpack.c.l.s8.bf16 %v432_v25  ;;  %v770_v30 = vunpack.c.l.s8.bf16 %v434_v26 }
 0x103   : > { %1207 = vmatprep.subr.bf16.mxu0 %v932_v32  ;;  %1248 = vmatprep.subr.bf16.mxu1 %v934_v33  ;;  %v431_v32 = vld [vmem:[%s3068_s29 + $0x3e0] sm:$0xff]  ;;  %v433_v33 = vld [vmem:[%s3068_s29 + $0x3f0] sm:$0xff] }
 0x104   : > { %v767_v34 = vunpack.c.l.s8.bf16 %v431_v32  ;;  %v769_v35 = vunpack.c.l.s8.bf16 %v433_v33  ;;  %v795_v41 = vunpack.c.h.s8.bf16 %v431_v32  ;;  %v797_v42 = vunpack.c.h.s8.bf16 %v433_v33 }
 0x106   : > { %1208 = vmatpush1.bf16.msra.mxu0 %v931_v37  ;;  %1249 = vmatpush1.bf16.msra.mxu1 %v933_v38  ;;  %v796_v37 = vunpack.c.h.s8.bf16 %v432_v25  ;;  %v798_v38 = vunpack.c.h.s8.bf16 %v434_v26 }
 0x107   : > { %1209 = vmatprep.subr.bf16.mxu0 %v960_v39  ;;  %1250 = vmatprep.subr.bf16.mxu1 %v962_v40  ;;  %v460_v39 = vld [vmem:[%s3068_s29 + $0x4c8] sm:$0xff]  ;;  %v462_v40 = vld [vmem:[%s3068_s29 + $0x4d8] sm:$0xff] }
 0x10a   : > { %1210 = vmatpush1.bf16.msra.mxu0 %v959_v44  ;;  %1251 = vmatpush1.bf16.msra.mxu1 %v961_v45  ;;  %v824_v44 = vunpack.c.l.s8.bf16 %v460_v39  ;;  %v826_v45 = vunpack.c.l.s8.bf16 %v462_v40 }
 0x10b   : > { %1261 = vmatprep.subr.bf16.mxu0 %v544_v46  ;;  %1302 = vmatprep.subr.bf16.mxu1 %v546_v47  ;;  %v459_v46 = vld [vmem:[%s3068_s29 + $0x4c0] sm:$0xff]  ;;  %v461_v47 = vld [vmem:[%s3068_s29 + $0x4d0] sm:$0xff] }
 0x10c   : > { %v823_v48 = vunpack.c.l.s8.bf16 %v459_v46  ;;  %v825_v49 = vunpack.c.l.s8.bf16 %v461_v47  ;;  %v851_v53 = vunpack.c.h.s8.bf16 %v459_v46  ;;  %v853_v54 = vunpack.c.h.s8.bf16 %v461_v47 }
 0x10d   : > { %1212 = vmatmul.mubr.bf16.vlgmr.msra.gmra.mrb[8].mxu0 %v3140_v43  ;;  %1253 = vmatmul.mubr.bf16.vlgmr.msra.gmra.mrb[8].mxu1 %v3140_v43 }
 0x10e   : > { %1262 = vmatpush1.bf16.msra.mxu0 %v543_v31  ;;  %1303 = vmatpush1.bf16.msra.mxu1 %v545_v50  ;;  %v852_v31 = vunpack.c.h.s8.bf16 %v460_v39  ;;  %v854_v50 = vunpack.c.h.s8.bf16 %v462_v40 }
 0x10f   : > { %1263 = vmatprep.subr.bf16.mxu0 %v572_v51  ;;  %1304 = vmatprep.subr.bf16.mxu1 %v574_v52  ;;  %v488_v51 = vld [vmem:[%s3068_s29 + $0x5a8] sm:$0xff]  ;;  %v490_v52 = vld [vmem:[%s3068_s29 + $0x5b8] sm:$0xff] }
 0x110   : > { %1293 = vmatprep.mubr.bf16.mxu0 %v3110_v36  ;;  %1334 = vmatprep.mubr.bf16.mxu1 %v3110_v36 }
 0x112   : > { %1264 = vmatpush1.bf16.msra.mxu0 %v571_v55  ;;  %1305 = vmatpush1.bf16.msra.mxu1 %v573_v56  ;;  %v880_v55 = vunpack.c.l.s8.bf16 %v488_v51  ;;  %v882_v56 = vunpack.c.l.s8.bf16 %v490_v52 }
 0x113   : > { %1265 = vmatprep.subr.bf16.mxu0 %v600_v57  ;;  %1306 = vmatprep.subr.bf16.mxu1 %v602_v58  ;;  %v487_v57 = vld [vmem:[%s3068_s29 + $0x5a0] sm:$0xff]  ;;  %v489_v58 = vld [vmem:[%s3068_s29 + $0x5b0] sm:$0xff] }
 0x114   : > { %v879_v59 = vunpack.c.l.s8.bf16 %v487_v57  ;;  %v881_v60 = vunpack.c.l.s8.bf16 %v489_v58  ;;  %v907_v1 = vunpack.c.h.s8.bf16 %v487_v57  ;;  %v909_v2 = vunpack.c.h.s8.bf16 %v489_v58 }
 0x116   : > { %1266 = vmatpush1.bf16.msra.mxu0 %v599_v61  ;;  %1307 = vmatpush1.bf16.msra.mxu1 %v601_v62  ;;  %v908_v61 = vunpack.c.h.s8.bf16 %v488_v51  ;;  %v910_v62 = vunpack.c.h.s8.bf16 %v490_v52  ;;  %v979_v51 = vld [vmem:[#allocation2] sm:$0xff]  ;;  %v981_v52 = vld [vmem:[#allocation2 + $0x10] sm:$0xff] }
 0x117   : > { %1267 = vmatprep.subr.bf16.mxu0 %v628_v63  ;;  %1308 = vmatprep.subr.bf16.mxu1 %v630_v0  ;;  %v516_v63 = vld [vmem:[%s3068_s29 + $0x688] sm:$0xff]  ;;  %v518_v0 = vld [vmem:[%s3068_s29 + $0x698] sm:$0xff] }
 0x11a   : > { %1268 = vmatpush1.bf16.msra.mxu0 %v627_v3  ;;  %1309 = vmatpush1.bf16.msra.mxu1 %v629_v4  ;;  %v936_v3 = vunpack.c.l.s8.bf16 %v516_v63  ;;  %v938_v4 = vunpack.c.l.s8.bf16 %v518_v0 }
 0x11b   : > { %1269 = vmatprep.subr.bf16.mxu0 %v656_v5  ;;  %1310 = vmatprep.subr.bf16.mxu1 %v658_v6  ;;  %v515_v5 = vld [vmem:[%s3068_s29 + $0x680] sm:$0xff]  ;;  %v517_v6 = vld [vmem:[%s3068_s29 + $0x690] sm:$0xff] }
 0x11c   : > { %v935_v7 = vunpack.c.l.s8.bf16 %v515_v5  ;;  %v937_v8 = vunpack.c.l.s8.bf16 %v517_v6  ;;  %v963_v13 = vunpack.c.h.s8.bf16 %v515_v5  ;;  %v965_v14 = vunpack.c.h.s8.bf16 %v517_v6 }
 0x11e   : > { %1270 = vmatpush1.bf16.msra.mxu0 %v655_v9  ;;  %1311 = vmatpush1.bf16.msra.mxu1 %v657_v10  ;;  %v964_v9 = vunpack.c.h.s8.bf16 %v516_v63  ;;  %v966_v10 = vunpack.c.h.s8.bf16 %v518_v0 }
 0x11f   : > { %1271 = vmatprep.subr.bf16.mxu0 %v684_v11  ;;  %1312 = vmatprep.subr.bf16.mxu1 %v686_v12  ;;  %v324_v11 = vld [vmem:[%s3068_s29 + $0x88] sm:$0xff]  ;;  %v326_v12 = vld [vmem:[%s3068_s29 + $0x98] sm:$0xff] }
 0x122   : > { %1272 = vmatpush1.bf16.msra.mxu0 %v683_v15  ;;  %1313 = vmatpush1.bf16.msra.mxu1 %v685_v16  ;;  %v548_v15 = vunpack.c.l.s8.bf16 %v324_v11  ;;  %v550_v16 = vunpack.c.l.s8.bf16 %v326_v12 }
 0x123   : > { %1273 = vmatprep.subr.bf16.mxu0 %v712_v17  ;;  %1314 = vmatprep.subr.bf16.mxu1 %v714_v18  ;;  %v323_v17 = vld [vmem:[%s3068_s29 + $0x80] sm:$0xff]  ;;  %v325_v18 = vld [vmem:[%s3068_s29 + $0x90] sm:$0xff] }
 0x124   : > { %v547_v19 = vunpack.c.l.s8.bf16 %v323_v17  ;;  %v549_v20 = vunpack.c.l.s8.bf16 %v325_v18  ;;  %v575_v25 = vunpack.c.h.s8.bf16 %v323_v17  ;;  %v577_v26 = vunpack.c.h.s8.bf16 %v325_v18 }
 0x126   : > { %1274 = vmatpush1.bf16.msra.mxu0 %v711_v21  ;;  %1315 = vmatpush1.bf16.msra.mxu1 %v713_v22  ;;  %v576_v21 = vunpack.c.h.s8.bf16 %v324_v11  ;;  %v578_v22 = vunpack.c.h.s8.bf16 %v326_v12 }
 0x127   : > { %1275 = vmatprep.subr.bf16.mxu0 %v740_v23  ;;  %1316 = vmatprep.subr.bf16.mxu1 %v742_v24  ;;  %v352_v23 = vld [vmem:[%s3068_s29 + $0x168] sm:$0xff]  ;;  %v354_v24 = vld [vmem:[%s3068_s29 + $0x178] sm:$0xff] }
 0x12a   : > { %1276 = vmatpush1.bf16.msra.mxu0 %v739_v27  ;;  %1317 = vmatpush1.bf16.msra.mxu1 %v741_v28  ;;  %v604_v27 = vunpack.c.l.s8.bf16 %v352_v23  ;;  %v606_v28 = vunpack.c.l.s8.bf16 %v354_v24 }
 0x12b   : > { %1277 = vmatprep.subr.bf16.mxu0 %v768_v29  ;;  %1318 = vmatprep.subr.bf16.mxu1 %v770_v30  ;;  %v351_v29 = vld [vmem:[%s3068_s29 + $0x160] sm:$0xff]  ;;  %v353_v30 = vld [vmem:[%s3068_s29 + $0x170] sm:$0xff] }
 0x12c   : > { %v603_v32 = vunpack.c.l.s8.bf16 %v351_v29  ;;  %v605_v33 = vunpack.c.l.s8.bf16 %v353_v30  ;;  %v631_v39 = vunpack.c.h.s8.bf16 %v351_v29  ;;  %v633_v40 = vunpack.c.h.s8.bf16 %v353_v30 }
 0x12e   : > { %1278 = vmatpush1.bf16.msra.mxu0 %v767_v34  ;;  %1319 = vmatpush1.bf16.msra.mxu1 %v769_v35  ;;  %v632_v34 = vunpack.c.h.s8.bf16 %v352_v23  ;;  %v634_v35 = vunpack.c.h.s8.bf16 %v354_v24 }
 0x12f   : > { %1279 = vmatprep.subr.bf16.mxu0 %v796_v37  ;;  %1320 = vmatprep.subr.bf16.mxu1 %v798_v38  ;;  %v380_v37 = vld [vmem:[%s3068_s29 + $0x248] sm:$0xff]  ;;  %v382_v38 = vld [vmem:[%s3068_s29 + $0x258] sm:$0xff] }
 0x132   : > { %1280 = vmatpush1.bf16.msra.mxu0 %v795_v41  ;;  %1321 = vmatpush1.bf16.msra.mxu1 %v797_v42  ;;  %v660_v41 = vunpack.c.l.s8.bf16 %v380_v37  ;;  %v662_v42 = vunpack.c.l.s8.bf16 %v382_v38 }
 0x133   : > { %1281 = vmatprep.subr.bf16.mxu0 %v824_v44  ;;  %1322 = vmatprep.subr.bf16.mxu1 %v826_v45  ;;  %v379_v44 = vld [vmem:[%s3068_s29 + $0x240] sm:$0xff]  ;;  %v381_v45 = vld [vmem:[%s3068_s29 + $0x250] sm:$0xff] }
 0x134   : > { %v659_v46 = vunpack.c.l.s8.bf16 %v379_v44  ;;  %v661_v47 = vunpack.c.l.s8.bf16 %v381_v45 }
 0x136   : > { %1282 = vmatpush1.bf16.msra.mxu0 %v823_v48  ;;  %1323 = vmatpush1.bf16.msra.mxu1 %v825_v49  ;;  %v688_v48 = vunpack.c.h.s8.bf16 %v380_v37  ;;  %v690_v49 = vunpack.c.h.s8.bf16 %v382_v38 }
 0x137   : > { %1283 = vmatprep.subr.bf16.mxu0 %v852_v31  ;;  %1324 = vmatprep.subr.bf16.mxu1 %v854_v50  ;;  %v408_v31 = vld [vmem:[%s3068_s29 + $0x328] sm:$0xff]  ;;  %v410_v50 = vld [vmem:[%s3068_s29 + $0x338] sm:$0xff] }
 0x138   : > { %v716_v57 = vunpack.c.l.s8.bf16 %v408_v31  ;;  %v718_v58 = vunpack.c.l.s8.bf16 %v410_v50  ;;  %v744_v11 = vunpack.c.h.s8.bf16 %v408_v31  ;;  %v746_v12 = vunpack.c.h.s8.bf16 %v410_v50 }
 0x13a   : > { %1284 = vmatpush1.bf16.msra.mxu0 %v851_v53  ;;  %1325 = vmatpush1.bf16.msra.mxu1 %v853_v54  ;;  %v980_v53 = vld [vmem:[#allocation2 + $0x8] sm:$0xff]  ;;  %v687_v54 = vunpack.c.h.s8.bf16 %v379_v44 }
 0x13b   : > { %1285 = vmatprep.subr.bf16.mxu0 %v880_v55  ;;  %1326 = vmatprep.subr.bf16.mxu1 %v882_v56  ;;  %v689_v55 = vunpack.c.h.s8.bf16 %v381_v45  ;;  %v982_v56 = vld [vmem:[#allocation2 + $0x18] sm:$0xff] }
 0x13e   : > { %1286 = vmatpush1.bf16.msra.mxu0 %v879_v59  ;;  %1327 = vmatpush1.bf16.msra.mxu1 %v881_v60  ;;  %v407_v59 = vld [vmem:[%s3068_s29 + $0x320] sm:$0xff]  ;;  %v409_v60 = vld [vmem:[%s3068_s29 + $0x330] sm:$0xff] }
 0x13f   : > { %1287 = vmatprep.subr.bf16.mxu0 %v908_v61  ;;  %1328 = vmatprep.subr.bf16.mxu1 %v910_v62 }
 0x142   : > { %1288 = vmatpush1.bf16.msra.mxu0 %v907_v1  ;;  %1329 = vmatpush1.bf16.msra.mxu1 %v909_v2 }
 0x143   : > { %1289 = vmatprep.subr.bf16.mxu0 %v936_v3  ;;  %1330 = vmatprep.subr.bf16.mxu1 %v938_v4 }
 0x146   : > { %1290 = vmatpush1.bf16.msra.mxu0 %v935_v7  ;;  %1331 = vmatpush1.bf16.msra.mxu1 %v937_v8  ;;  %v715_v7 = vunpack.c.l.s8.bf16 %v407_v59  ;;  %v717_v8 = vunpack.c.l.s8.bf16 %v409_v60 }
 0x147   : > { %1291 = vmatprep.subr.bf16.mxu0 %v964_v9  ;;  %1332 = vmatprep.subr.bf16.mxu1 %v966_v10 }
 0x14a   : > { %1292 = vmatpush1.bf16.msra.mxu0 %v963_v13  ;;  %1333 = vmatpush1.bf16.msra.mxu1 %v965_v14  ;;  %v436_v13 = vld [vmem:[%s3068_s29 + $0x408] sm:$0xff]  ;;  %v438_v14 = vld [vmem:[%s3068_s29 + $0x418] sm:$0xff] }
 0x14b   : > { %1343 = vmatprep.subr.bf16.mxu0 %v548_v15  ;;  %1384 = vmatprep.subr.bf16.mxu1 %v550_v16  ;;  %v743_v15 = vunpack.c.h.s8.bf16 %v407_v59  ;;  %v745_v16 = vunpack.c.h.s8.bf16 %v409_v60  ;;  %v772_v17 = vunpack.c.l.s8.bf16 %v436_v13  ;;  %v774_v18 = vunpack.c.l.s8.bf16 %v438_v14 }
 0x14c   : > { %v800_v23 = vunpack.c.h.s8.bf16 %v436_v13  ;;  %v802_v24 = vunpack.c.h.s8.bf16 %v438_v14 }
 0x14d   : > { %1294 = vmatmul.mubr.bf16.vlgmr.msra.gmra.mrb[12].mxu0 %v3140_v43  ;;  %1335 = vmatmul.mubr.bf16.vlgmr.msra.gmra.mrb[12].mxu1 %v3140_v43 }
 0x14e   : > { %1344 = vmatpush1.bf16.msra.mxu0 %v547_v19  ;;  %1385 = vmatpush1.bf16.msra.mxu1 %v549_v20  ;;  %v435_v19 = vld [vmem:[%s3068_s29 + $0x400] sm:$0xff]  ;;  %v437_v20 = vld [vmem:[%s3068_s29 + $0x410] sm:$0xff] }
 0x14f   : > { %1345 = vmatprep.subr.bf16.mxu0 %v576_v21  ;;  %1386 = vmatprep.subr.bf16.mxu1 %v578_v22  ;;  %v771_v21 = vunpack.c.l.s8.bf16 %v435_v19  ;;  %v773_v22 = vunpack.c.l.s8.bf16 %v437_v20 }
 0x150   : > { %1375 = vmatprep.mubr.bf16.mxu0 %v3110_v36  ;;  %1416 = vmatprep.mubr.bf16.mxu1 %v3110_v36 }
 0x152   : > { %1346 = vmatpush1.bf16.msra.mxu0 %v575_v25  ;;  %1387 = vmatpush1.bf16.msra.mxu1 %v577_v26  ;;  %v464_v25 = vld [vmem:[%s3068_s29 + $0x4e8] sm:$0xff]  ;;  %v466_v26 = vld [vmem:[%s3068_s29 + $0x4f8] sm:$0xff] }
 0x153   : > { %1347 = vmatprep.subr.bf16.mxu0 %v604_v27  ;;  %1388 = vmatprep.subr.bf16.mxu1 %v606_v28  ;;  %v799_v27 = vunpack.c.h.s8.bf16 %v435_v19  ;;  %v801_v28 = vunpack.c.h.s8.bf16 %v437_v20  ;;  %v828_v29 = vunpack.c.l.s8.bf16 %v464_v25  ;;  %v830_v30 = vunpack.c.l.s8.bf16 %v466_v26 }
 0x154   : > { %v856_v37 = vunpack.c.h.s8.bf16 %v464_v25  ;;  %v858_v38 = vunpack.c.h.s8.bf16 %v466_v26 }
 0x156   : > { %1348 = vmatpush1.bf16.msra.mxu0 %v603_v32  ;;  %1389 = vmatpush1.bf16.msra.mxu1 %v605_v33  ;;  %v463_v32 = vld [vmem:[%s3068_s29 + $0x4e0] sm:$0xff]  ;;  %v465_v33 = vld [vmem:[%s3068_s29 + $0x4f0] sm:$0xff] }
 0x157   : > { %1349 = vmatprep.subr.bf16.mxu0 %v632_v34  ;;  %1390 = vmatprep.subr.bf16.mxu1 %v634_v35  ;;  %v827_v34 = vunpack.c.l.s8.bf16 %v463_v32  ;;  %v829_v35 = vunpack.c.l.s8.bf16 %v465_v33 }
 0x15a   : > { %1350 = vmatpush1.bf16.msra.mxu0 %v631_v39  ;;  %1391 = vmatpush1.bf16.msra.mxu1 %v633_v40  ;;  %v492_v39 = vld [vmem:[%s3068_s29 + $0x5c8] sm:$0xff]  ;;  %v494_v40 = vld [vmem:[%s3068_s29 + $0x5d8] sm:$0xff] }
 0x15b   : > { %1351 = vmatprep.subr.bf16.mxu0 %v660_v41  ;;  %1392 = vmatprep.subr.bf16.mxu1 %v662_v42  ;;  %v855_v41 = vunpack.c.h.s8.bf16 %v463_v32  ;;  %v857_v42 = vunpack.c.h.s8.bf16 %v465_v33  ;;  %v884_v44 = vunpack.c.l.s8.bf16 %v492_v39  ;;  %v886_v45 = vunpack.c.l.s8.bf16 %v494_v40 }
 0x15c   : > { %v912_v31 = vunpack.c.h.s8.bf16 %v492_v39  ;;  %v914_v50 = vunpack.c.h.s8.bf16 %v494_v40  ;;  %v983_v39 = vld [vmem:[#allocation2 + $0x20] sm:$0xff]  ;;  %v985_v40 = vld [vmem:[#allocation2 + $0x30] sm:$0xff] }
 0x15e   : > { %1352 = vmatpush1.bf16.msra.mxu0 %v659_v46  ;;  %1393 = vmatpush1.bf16.msra.mxu1 %v661_v47  ;;  %v491_v46 = vld [vmem:[%s3068_s29 + $0x5c0] sm:$0xff]  ;;  %v493_v47 = vld [vmem:[%s3068_s29 + $0x5d0] sm:$0xff] }
 0x15f   : > { %1353 = vmatprep.subr.bf16.mxu0 %v688_v48  ;;  %1394 = vmatprep.subr.bf16.mxu1 %v690_v49  ;;  %v883_v48 = vunpack.c.l.s8.bf16 %v491_v46  ;;  %v885_v49 = vunpack.c.l.s8.bf16 %v493_v47 }
 0x160   : > { %v1049_v61 = vpop.f32.mrb[0].mxu0  ;;  %v1090_v62 = vpop.f32.mrb[0].mxu1 }
 0x161   : > { %v1589_v63 = vadd.f32 %v1049_v61, %v979_v51  ;;  %v1591_v0 = vadd.f32 %v1090_v62, %v981_v52  ;;  %v1051_v1 = vpop.f32.mrb[1].mxu0  ;;  %v1092_v2 = vpop.f32.mrb[1].mxu1  ;;  %v520_v51 = vld [vmem:[%s3068_s29 + $0x6a8] sm:$0xff]  ;;  %v522_v52 = vld [vmem:[%s3068_s29 + $0x6b8] sm:$0xff] }
 0x162   : > { %v1590_v3 = vadd.f32 %v1051_v1, %v980_v53  ;;  %v1592_v4 = vadd.f32 %v1092_v2, %v982_v56  ;;  %v1053_v5 = vpop.f32.mrb[2].mxu0  ;;  %v1094_v6 = vpop.f32.mrb[2].mxu1  ;;  %1354 = vmatpush1.bf16.msra.mxu0 %v687_v54  ;;  %1395 = vmatpush1.bf16.msra.mxu1 %v689_v55  ;;  %v911_v53 = vunpack.c.h.s8.bf16 %v491_v46  ;;  %v913_v54 = vunpack.c.h.s8.bf16 %v493_v47 }
 0x163   : > { %1617 = vst [vmem:[#allocation2] sm:$0xff] %v1589_v63  ;;  %1619 = vst [vmem:[#allocation2 + $0x10] sm:$0xff] %v1591_v0  ;;  %v1054_v9 = vpop.f32.mrb[3].mxu0  ;;  %v1095_v10 = vpop.f32.mrb[3].mxu1  ;;  %1355 = vmatprep.subr.bf16.mxu0 %v716_v57  ;;  %1396 = vmatprep.subr.bf16.mxu1 %v718_v58  ;;  %v940_v55 = vunpack.c.l.s8.bf16 %v520_v51  ;;  %v942_v56 = vunpack.c.l.s8.bf16 %v522_v52  ;;  %v519_v57 = vld [vmem:[%s3068_s29 + $0x6a0] sm:$0xff]  ;;  %v521_v58 = vld [vmem:[%s3068_s29 + $0x6b0] sm:$0xff]  ;;  %v968_v61 = vunpack.c.h.s8.bf16 %v520_v51  ;;  %v970_v62 = vunpack.c.h.s8.bf16 %v522_v52 }
 0x164   : > { %1618 = vst [vmem:[#allocation2 + $0x8] sm:$0xff] %v1590_v3  ;;  %1620 = vst [vmem:[#allocation2 + $0x18] sm:$0xff] %v1592_v4  ;;  %v939_v59 = vunpack.c.l.s8.bf16 %v519_v57  ;;  %v941_v60 = vunpack.c.l.s8.bf16 %v521_v58  ;;  %v328_v63 = vld [vmem:[%s3068_s29 + $0xa8] sm:$0xff]  ;;  %v330_v0 = vld [vmem:[%s3068_s29 + $0xb8] sm:$0xff]  ;;  %v967_v1 = vunpack.c.h.s8.bf16 %v519_v57  ;;  %v969_v2 = vunpack.c.h.s8.bf16 %v521_v58 }
 0x165   : > { %v552_v3 = vunpack.c.l.s8.bf16 %v328_v63  ;;  %v554_v4 = vunpack.c.l.s8.bf16 %v330_v0  ;;  %v327_v5 = vld [vmem:[%s3068_s29 + $0xa0] sm:$0xff]  ;;  %v329_v6 = vld [vmem:[%s3068_s29 + $0xb0] sm:$0xff]  ;;  %v580_v9 = vunpack.c.h.s8.bf16 %v328_v63  ;;  %v582_v10 = vunpack.c.h.s8.bf16 %v330_v0 }
 0x166   : > { %1356 = vmatpush1.bf16.msra.mxu0 %v715_v7  ;;  %1397 = vmatpush1.bf16.msra.mxu1 %v717_v8  ;;  %v551_v7 = vunpack.c.l.s8.bf16 %v327_v5  ;;  %v553_v8 = vunpack.c.l.s8.bf16 %v329_v6  ;;  %v579_v13 = vunpack.c.h.s8.bf16 %v327_v5  ;;  %v581_v14 = vunpack.c.h.s8.bf16 %v329_v6 }
 0x167   : > { %1357 = vmatprep.subr.bf16.mxu0 %v744_v11  ;;  %1398 = vmatprep.subr.bf16.mxu1 %v746_v12  ;;  %v356_v11 = vld [vmem:[%s3068_s29 + $0x188] sm:$0xff]  ;;  %v358_v12 = vld [vmem:[%s3068_s29 + $0x198] sm:$0xff] }
 0x16a   : > { %1358 = vmatpush1.bf16.msra.mxu0 %v743_v15  ;;  %1399 = vmatpush1.bf16.msra.mxu1 %v745_v16  ;;  %v608_v15 = vunpack.c.l.s8.bf16 %v356_v11  ;;  %v610_v16 = vunpack.c.l.s8.bf16 %v358_v12 }
 0x16b   : > { %1359 = vmatprep.subr.bf16.mxu0 %v772_v17  ;;  %1400 = vmatprep.subr.bf16.mxu1 %v774_v18  ;;  %v355_v17 = vld [vmem:[%s3068_s29 + $0x180] sm:$0xff]  ;;  %v357_v18 = vld [vmem:[%s3068_s29 + $0x190] sm:$0xff] }
 0x16c   : > { %v607_v19 = vunpack.c.l.s8.bf16 %v355_v17  ;;  %v609_v20 = vunpack.c.l.s8.bf16 %v357_v18  ;;  %v635_v25 = vunpack.c.h.s8.bf16 %v355_v17  ;;  %v637_v26 = vunpack.c.h.s8.bf16 %v357_v18 }
 0x16e   : > { %1360 = vmatpush1.bf16.msra.mxu0 %v771_v21  ;;  %1401 = vmatpush1.bf16.msra.mxu1 %v773_v22  ;;  %v636_v21 = vunpack.c.h.s8.bf16 %v356_v11  ;;  %v638_v22 = vunpack.c.h.s8.bf16 %v358_v12 }
 0x16f   : > { %1361 = vmatprep.subr.bf16.mxu0 %v800_v23  ;;  %1402 = vmatprep.subr.bf16.mxu1 %v802_v24  ;;  %v384_v23 = vld [vmem:[%s3068_s29 + $0x268] sm:$0xff]  ;;  %v386_v24 = vld [vmem:[%s3068_s29 + $0x278] sm:$0xff] }
 0x172   : > { %1362 = vmatpush1.bf16.msra.mxu0 %v799_v27  ;;  %1403 = vmatpush1.bf16.msra.mxu1 %v801_v28  ;;  %v664_v27 = vunpack.c.l.s8.bf16 %v384_v23  ;;  %v666_v28 = vunpack.c.l.s8.bf16 %v386_v24 }
 0x173   : > { %1363 = vmatprep.subr.bf16.mxu0 %v828_v29  ;;  %1404 = vmatprep.subr.bf16.mxu1 %v830_v30  ;;  %v383_v29 = vld [vmem:[%s3068_s29 + $0x260] sm:$0xff]  ;;  %v385_v30 = vld [vmem:[%s3068_s29 + $0x270] sm:$0xff] }
 0x174   : > { %v663_v32 = vunpack.c.l.s8.bf16 %v383_v29  ;;  %v665_v33 = vunpack.c.l.s8.bf16 %v385_v30 }
 0x176   : > { %1364 = vmatpush1.bf16.msra.mxu0 %v827_v34  ;;  %1405 = vmatpush1.bf16.msra.mxu1 %v829_v35  ;;  %v692_v34 = vunpack.c.h.s8.bf16 %v384_v23  ;;  %v694_v35 = vunpack.c.h.s8.bf16 %v386_v24 }
 0x177   : > { %1365 = vmatprep.subr.bf16.mxu0 %v856_v37  ;;  %1406 = vmatprep.subr.bf16.mxu1 %v858_v38  ;;  %v412_v37 = vld [vmem:[%s3068_s29 + $0x348] sm:$0xff]  ;;  %v414_v38 = vld [vmem:[%s3068_s29 + $0x358] sm:$0xff] }
 0x178   : > { %v720_v46 = vunpack.c.l.s8.bf16 %v412_v37  ;;  %v722_v47 = vunpack.c.l.s8.bf16 %v414_v38  ;;  %v748_v63 = vunpack.c.h.s8.bf16 %v412_v37  ;;  %v750_v0 = vunpack.c.h.s8.bf16 %v414_v38 }
 0x17a   : > { %1366 = vmatpush1.bf16.msra.mxu0 %v855_v41  ;;  %1407 = vmatpush1.bf16.msra.mxu1 %v857_v42  ;;  %v984_v41 = vld [vmem:[#allocation2 + $0x28] sm:$0xff]  ;;  %v691_v42 = vunpack.c.h.s8.bf16 %v383_v29 }
 0x17b   : > { %1367 = vmatprep.subr.bf16.mxu0 %v884_v44  ;;  %1408 = vmatprep.subr.bf16.mxu1 %v886_v45  ;;  %v693_v44 = vunpack.c.h.s8.bf16 %v385_v30  ;;  %v986_v45 = vld [vmem:[#allocation2 + $0x38] sm:$0xff] }
 0x17e   : > { %1368 = vmatpush1.bf16.msra.mxu0 %v883_v48  ;;  %1409 = vmatpush1.bf16.msra.mxu1 %v885_v49  ;;  %v411_v48 = vld [vmem:[%s3068_s29 + $0x340] sm:$0xff]  ;;  %v413_v49 = vld [vmem:[%s3068_s29 + $0x350] sm:$0xff] }
 0x17f   : > { %1369 = vmatprep.subr.bf16.mxu0 %v912_v31  ;;  %1410 = vmatprep.subr.bf16.mxu1 %v914_v50 }
 0x182   : > { %1370 = vmatpush1.bf16.msra.mxu0 %v911_v53  ;;  %1411 = vmatpush1.bf16.msra.mxu1 %v913_v54 }
 0x183   : > { %1371 = vmatprep.subr.bf16.mxu0 %v940_v55  ;;  %1412 = vmatprep.subr.bf16.mxu1 %v942_v56 }
 0x186   : > { %1372 = vmatpush1.bf16.msra.mxu0 %v939_v59  ;;  %1413 = vmatpush1.bf16.msra.mxu1 %v941_v60  ;;  %v719_v59 = vunpack.c.l.s8.bf16 %v411_v48  ;;  %v721_v60 = vunpack.c.l.s8.bf16 %v413_v49 }
 0x187   : > { %1373 = vmatprep.subr.bf16.mxu0 %v968_v61  ;;  %1414 = vmatprep.subr.bf16.mxu1 %v970_v62 }
 0x18a   : > { %1374 = vmatpush1.bf16.msra.mxu0 %v967_v1  ;;  %1415 = vmatpush1.bf16.msra.mxu1 %v969_v2  ;;  %v440_v1 = vld [vmem:[%s3068_s29 + $0x428] sm:$0xff]  ;;  %v442_v2 = vld [vmem:[%s3068_s29 + $0x438] sm:$0xff] }
 0x18b   : > { %1425 = vmatprep.subr.bf16.mxu0 %v552_v3  ;;  %1466 = vmatprep.subr.bf16.mxu1 %v554_v4  ;;  %v747_v3 = vunpack.c.h.s8.bf16 %v411_v48  ;;  %v749_v4 = vunpack.c.h.s8.bf16 %v413_v49  ;;  %v776_v5 = vunpack.c.l.s8.bf16 %v440_v1  ;;  %v778_v6 = vunpack.c.l.s8.bf16 %v442_v2 }
 0x18c   : > { %v804_v11 = vunpack.c.h.s8.bf16 %v440_v1  ;;  %v806_v12 = vunpack.c.h.s8.bf16 %v442_v2 }
 0x18d   : > { %1376 = vmatmul.mubr.bf16.vlgmr.msra.gmra.mrb[16].mxu0 %v3140_v43  ;;  %1417 = vmatmul.mubr.bf16.vlgmr.msra.gmra.mrb[16].mxu1 %v3140_v43 }
 0x18e   : > { %1426 = vmatpush1.bf16.msra.mxu0 %v551_v7  ;;  %1467 = vmatpush1.bf16.msra.mxu1 %v553_v8  ;;  %v439_v7 = vld [vmem:[%s3068_s29 + $0x420] sm:$0xff]  ;;  %v441_v8 = vld [vmem:[%s3068_s29 + $0x430] sm:$0xff] }
 0x18f   : > { %1427 = vmatprep.subr.bf16.mxu0 %v580_v9  ;;  %1468 = vmatprep.subr.bf16.mxu1 %v582_v10  ;;  %v775_v9 = vunpack.c.l.s8.bf16 %v439_v7  ;;  %v777_v10 = vunpack.c.l.s8.bf16 %v441_v8 }
 0x190   : > { %1457 = vmatprep.mubr.bf16.mxu0 %v3110_v36  ;;  %1498 = vmatprep.mubr.bf16.mxu1 %v3110_v36 }
 0x192   : > { %1428 = vmatpush1.bf16.msra.mxu0 %v579_v13  ;;  %1469 = vmatpush1.bf16.msra.mxu1 %v581_v14  ;;  %v468_v13 = vld [vmem:[%s3068_s29 + $0x508] sm:$0xff]  ;;  %v470_v14 = vld [vmem:[%s3068_s29 + $0x518] sm:$0xff] }
 0x193   : > { %1429 = vmatprep.subr.bf16.mxu0 %v608_v15  ;;  %1470 = vmatprep.subr.bf16.mxu1 %v610_v16  ;;  %v803_v15 = vunpack.c.h.s8.bf16 %v439_v7  ;;  %v805_v16 = vunpack.c.h.s8.bf16 %v441_v8  ;;  %v832_v17 = vunpack.c.l.s8.bf16 %v468_v13  ;;  %v834_v18 = vunpack.c.l.s8.bf16 %v470_v14 }
 0x194   : > { %v860_v23 = vunpack.c.h.s8.bf16 %v468_v13  ;;  %v862_v24 = vunpack.c.h.s8.bf16 %v470_v14 }
 0x196   : > { %1430 = vmatpush1.bf16.msra.mxu0 %v607_v19  ;;  %1471 = vmatpush1.bf16.msra.mxu1 %v609_v20  ;;  %v467_v19 = vld [vmem:[%s3068_s29 + $0x500] sm:$0xff]  ;;  %v469_v20 = vld [vmem:[%s3068_s29 + $0x510] sm:$0xff] }
 0x197   : > { %1431 = vmatprep.subr.bf16.mxu0 %v636_v21  ;;  %1472 = vmatprep.subr.bf16.mxu1 %v638_v22  ;;  %v831_v21 = vunpack.c.l.s8.bf16 %v467_v19  ;;  %v833_v22 = vunpack.c.l.s8.bf16 %v469_v20 }
 0x19a   : > { %1432 = vmatpush1.bf16.msra.mxu0 %v635_v25  ;;  %1473 = vmatpush1.bf16.msra.mxu1 %v637_v26  ;;  %v496_v25 = vld [vmem:[%s3068_s29 + $0x5e8] sm:$0xff]  ;;  %v498_v26 = vld [vmem:[%s3068_s29 + $0x5f8] sm:$0xff] }
 0x19b   : > { %1433 = vmatprep.subr.bf16.mxu0 %v664_v27  ;;  %1474 = vmatprep.subr.bf16.mxu1 %v666_v28  ;;  %v859_v27 = vunpack.c.h.s8.bf16 %v467_v19  ;;  %v861_v28 = vunpack.c.h.s8.bf16 %v469_v20  ;;  %v888_v29 = vunpack.c.l.s8.bf16 %v496_v25  ;;  %v890_v30 = vunpack.c.l.s8.bf16 %v498_v26 }
 0x19c   : > { %v916_v37 = vunpack.c.h.s8.bf16 %v496_v25  ;;  %v918_v38 = vunpack.c.h.s8.bf16 %v498_v26  ;;  %v989_v25 = vld [vmem:[#allocation2 + $0x50] sm:$0xff]  ;;  %v988_v26 = vld [vmem:[#allocation2 + $0x48] sm:$0xff] }
 0x19e   : > { %1434 = vmatpush1.bf16.msra.mxu0 %v663_v32  ;;  %1475 = vmatpush1.bf16.msra.mxu1 %v665_v33  ;;  %v495_v32 = vld [vmem:[%s3068_s29 + $0x5e0] sm:$0xff]  ;;  %v497_v33 = vld [vmem:[%s3068_s29 + $0x5f0] sm:$0xff] }
 0x19f   : > { %1435 = vmatprep.subr.bf16.mxu0 %v692_v34  ;;  %1476 = vmatprep.subr.bf16.mxu1 %v694_v35  ;;  %v887_v34 = vunpack.c.l.s8.bf16 %v495_v32  ;;  %v889_v35 = vunpack.c.l.s8.bf16 %v497_v33 }
 0x1a0   : > { %v1131_v31 = vpop.f32.mrb[4].mxu0  ;;  %v1172_v50 = vpop.f32.mrb[4].mxu1 }
 0x1a1   : > { %v1593_v51 = vadd.f32 %v1131_v31, %v983_v39  ;;  %v1595_v52 = vadd.f32 %v1172_v50, %v985_v40  ;;  %v1133_v53 = vpop.f32.mrb[5].mxu0  ;;  %v1174_v54 = vpop.f32.mrb[5].mxu1  ;;  %v524_v39 = vld [vmem:[%s3068_s29 + $0x6c8] sm:$0xff]  ;;  %v526_v40 = vld [vmem:[%s3068_s29 + $0x6d8] sm:$0xff] }
 0x1a2   : > { %v1594_v55 = vadd.f32 %v1133_v53, %v984_v41  ;;  %v1596_v56 = vadd.f32 %v1174_v54, %v986_v45  ;;  %v1135_v57 = vpop.f32.mrb[6].mxu0  ;;  %v1176_v58 = vpop.f32.mrb[6].mxu1  ;;  %1436 = vmatpush1.bf16.msra.mxu0 %v691_v42  ;;  %1477 = vmatpush1.bf16.msra.mxu1 %v693_v44  ;;  %v915_v41 = vunpack.c.h.s8.bf16 %v495_v32  ;;  %v917_v42 = vunpack.c.h.s8.bf16 %v497_v33  ;;  %v415_v33 = vld [vmem:[%s3068_s29 + $0x360] sm:$0xff] }
 0x1a3   : > { %1621 = vst [vmem:[#allocation2 + $0x20] sm:$0xff] %v1593_v51  ;;  %1623 = vst [vmem:[#allocation2 + $0x30] sm:$0xff] %v1595_v52  ;;  %v1136_v61 = vpop.f32.mrb[7].mxu0  ;;  %v1177_v62 = vpop.f32.mrb[7].mxu1  ;;  %1437 = vmatprep.subr.bf16.mxu0 %v720_v46  ;;  %1478 = vmatprep.subr.bf16.mxu1 %v722_v47  ;;  %v944_v44 = vunpack.c.l.s8.bf16 %v524_v39  ;;  %v946_v45 = vunpack.c.l.s8.bf16 %v526_v40  ;;  %v523_v46 = vld [vmem:[%s3068_s29 + $0x6c0] sm:$0xff]  ;;  %v525_v47 = vld [vmem:[%s3068_s29 + $0x6d0] sm:$0xff]  ;;  %v972_v31 = vunpack.c.h.s8.bf16 %v524_v39  ;;  %v974_v50 = vunpack.c.h.s8.bf16 %v526_v40 }
 0x1a4   : > { %1622 = vst [vmem:[#allocation2 + $0x28] sm:$0xff] %v1594_v55  ;;  %1624 = vst [vmem:[#allocation2 + $0x38] sm:$0xff] %v1596_v56  ;;  %v943_v48 = vunpack.c.l.s8.bf16 %v523_v46  ;;  %v945_v49 = vunpack.c.l.s8.bf16 %v525_v47  ;;  %v332_v51 = vld [vmem:[%s3068_s29 + $0xc8] sm:$0xff]  ;;  %v334_v52 = vld [vmem:[%s3068_s29 + $0xd8] sm:$0xff]  ;;  %v971_v53 = vunpack.c.h.s8.bf16 %v523_v46  ;;  %v973_v54 = vunpack.c.h.s8.bf16 %v525_v47 }
 0x1a5   : > { %v556_v55 = vunpack.c.l.s8.bf16 %v332_v51  ;;  %v558_v56 = vunpack.c.l.s8.bf16 %v334_v52  ;;  %v331_v57 = vld [vmem:[%s3068_s29 + $0xc0] sm:$0xff]  ;;  %v333_v58 = vld [vmem:[%s3068_s29 + $0xd0] sm:$0xff]  ;;  %v584_v61 = vunpack.c.h.s8.bf16 %v332_v51  ;;  %v586_v62 = vunpack.c.h.s8.bf16 %v334_v52  ;;  %v444_v52 = vld [vmem:[%s3068_s29 + $0x448] sm:$0xff] }
 0x1a6   : > { %1438 = vmatpush1.bf16.msra.mxu0 %v719_v59  ;;  %1479 = vmatpush1.bf16.msra.mxu1 %v721_v60  ;;  %v555_v59 = vunpack.c.l.s8.bf16 %v331_v57  ;;  %v557_v60 = vunpack.c.l.s8.bf16 %v333_v58  ;;  %v583_v1 = vunpack.c.h.s8.bf16 %v331_v57  ;;  %v585_v2 = vunpack.c.h.s8.bf16 %v333_v58  ;;  %v443_v58 = vld [vmem:[%s3068_s29 + $0x440] sm:$0xff] }
 0x1a7   : > { %1439 = vmatprep.subr.bf16.mxu0 %v748_v63  ;;  %1480 = vmatprep.subr.bf16.mxu1 %v750_v0  ;;  %v360_v63 = vld [vmem:[%s3068_s29 + $0x1a8] sm:$0xff]  ;;  %v362_v0 = vld [vmem:[%s3068_s29 + $0x1b8] sm:$0xff]  ;;  %v723_v47 = vunpack.c.l.s8.bf16 %v415_v33 }
 0x1aa   : > { %1440 = vmatpush1.bf16.msra.mxu0 %v747_v3  ;;  %1481 = vmatpush1.bf16.msra.mxu1 %v749_v4  ;;  %v612_v3 = vunpack.c.l.s8.bf16 %v360_v63  ;;  %v614_v4 = vunpack.c.l.s8.bf16 %v362_v0 }
 0x1ab   : > { %1441 = vmatprep.subr.bf16.mxu0 %v776_v5  ;;  %1482 = vmatprep.subr.bf16.mxu1 %v778_v6  ;;  %v359_v5 = vld [vmem:[%s3068_s29 + $0x1a0] sm:$0xff]  ;;  %v361_v6 = vld [vmem:[%s3068_s29 + $0x1b0] sm:$0xff] }
 0x1ac   : > { %v611_v7 = vunpack.c.l.s8.bf16 %v359_v5  ;;  %v613_v8 = vunpack.c.l.s8.bf16 %v361_v6  ;;  %v639_v13 = vunpack.c.h.s8.bf16 %v359_v5  ;;  %v641_v14 = vunpack.c.h.s8.bf16 %v361_v6  ;;  %v471_v6 = vld [vmem:[%s3068_s29 + $0x520] sm:$0xff] }
 0x1ae   : > { %1442 = vmatpush1.bf16.msra.mxu0 %v775_v9  ;;  %1483 = vmatpush1.bf16.msra.mxu1 %v777_v10  ;;  %v640_v9 = vunpack.c.h.s8.bf16 %v360_v63  ;;  %v642_v10 = vunpack.c.h.s8.bf16 %v362_v0  ;;  %v472_v0 = vld [vmem:[%s3068_s29 + $0x528] sm:$0xff] }
 0x1af   : > { %1443 = vmatprep.subr.bf16.mxu0 %v804_v11  ;;  %1484 = vmatprep.subr.bf16.mxu1 %v806_v12  ;;  %v388_v11 = vld [vmem:[%s3068_s29 + $0x288] sm:$0xff]  ;;  %v390_v12 = vld [vmem:[%s3068_s29 + $0x298] sm:$0xff] }
 0x1b0   : > { %v696_v20 = vunpack.c.h.s8.bf16 %v388_v11 }
 0x1b2   : > { %1444 = vmatpush1.bf16.msra.mxu0 %v803_v15  ;;  %1485 = vmatpush1.bf16.msra.mxu1 %v805_v16  ;;  %v670_v15 = vunpack.c.l.s8.bf16 %v390_v12  ;;  %v387_v16 = vld [vmem:[%s3068_s29 + $0x280] sm:$0xff] }
 0x1b3   : > { %1445 = vmatprep.subr.bf16.mxu0 %v832_v17  ;;  %1486 = vmatprep.subr.bf16.mxu1 %v834_v18  ;;  %v389_v17 = vld [vmem:[%s3068_s29 + $0x290] sm:$0xff]  ;;  %v667_v18 = vunpack.c.l.s8.bf16 %v387_v16 }
 0x1b4   : > { %v669_v19 = vunpack.c.l.s8.bf16 %v389_v17 }
 0x1b6   : > { %1446 = vmatpush1.bf16.msra.mxu0 %v831_v21  ;;  %1487 = vmatpush1.bf16.msra.mxu1 %v833_v22  ;;  %v698_v21 = vunpack.c.h.s8.bf16 %v390_v12  ;;  %v416_v22 = vld [vmem:[%s3068_s29 + $0x368] sm:$0xff] }
 0x1b7   : > { %1447 = vmatprep.subr.bf16.mxu0 %v860_v23  ;;  %1488 = vmatprep.subr.bf16.mxu1 %v862_v24  ;;  %v418_v23 = vld [vmem:[%s3068_s29 + $0x378] sm:$0xff]  ;;  %v987_v24 = vld [vmem:[#allocation2 + $0x40] sm:$0xff]  ;;  %v500_v12 = vld [vmem:[%s3068_s29 + $0x608] sm:$0xff] }
 0x1b8   : > { %v726_v32 = vunpack.c.l.s8.bf16 %v418_v23  ;;  %v754_v51 = vunpack.c.h.s8.bf16 %v418_v23  ;;  %v528_v23 = vld [vmem:[%s3068_s29 + $0x6e8] sm:$0xff] }
 0x1ba   : > { %1448 = vmatpush1.bf16.msra.mxu0 %v859_v27  ;;  %1489 = vmatpush1.bf16.msra.mxu1 %v861_v28  ;;  %v695_v27 = vunpack.c.h.s8.bf16 %v387_v16  ;;  %v697_v28 = vunpack.c.h.s8.bf16 %v389_v17  ;;  %v499_v17 = vld [vmem:[%s3068_s29 + $0x600] sm:$0xff] }
 0x1bb   : > { %1449 = vmatprep.subr.bf16.mxu0 %v888_v29  ;;  %1490 = vmatprep.subr.bf16.mxu1 %v890_v30  ;;  %v990_v29 = vld [vmem:[#allocation2 + $0x58] sm:$0xff]  ;;  %v724_v30 = vunpack.c.l.s8.bf16 %v416_v22 }
 0x1be   : > { %1450 = vmatpush1.bf16.msra.mxu0 %v887_v34  ;;  %1491 = vmatpush1.bf16.msra.mxu1 %v889_v35  ;;  %v417_v34 = vld [vmem:[%s3068_s29 + $0x370] sm:$0xff] }
 0x1bf   : > { %1451 = vmatprep.subr.bf16.mxu0 %v916_v37  ;;  %1492 = vmatprep.subr.bf16.mxu1 %v918_v38 }
 0x1c2   : > { %1452 = vmatpush1.bf16.msra.mxu0 %v915_v41  ;;  %1493 = vmatpush1.bf16.msra.mxu1 %v917_v42 }
 0x1c3   : > { %1453 = vmatprep.subr.bf16.mxu0 %v944_v44  ;;  %1494 = vmatprep.subr.bf16.mxu1 %v946_v45 }
 0x1c6   : > { %1454 = vmatpush1.bf16.msra.mxu0 %v943_v48  ;;  %1495 = vmatpush1.bf16.msra.mxu1 %v945_v49  ;;  %v725_v48 = vunpack.c.l.s8.bf16 %v417_v34 }
 0x1c7   : > { %1455 = vmatprep.subr.bf16.mxu0 %v972_v31  ;;  %1496 = vmatprep.subr.bf16.mxu1 %v974_v50  ;;  %v752_v50 = vunpack.c.h.s8.bf16 %v416_v22 }
 0x1ca   : > { %1456 = vmatpush1.bf16.msra.mxu0 %v971_v53  ;;  %1497 = vmatpush1.bf16.msra.mxu1 %v973_v54  ;;  %v446_v53 = vld [vmem:[%s3068_s29 + $0x458] sm:$0xff]  ;;  %v751_v54 = vunpack.c.h.s8.bf16 %v415_v33 }
 0x1cb   : > { %1507 = vmatprep.subr.bf16.mxu0 %v556_v55  ;;  %1548 = vmatprep.subr.bf16.mxu1 %v558_v56  ;;  %v753_v55 = vunpack.c.h.s8.bf16 %v417_v34  ;;  %v780_v56 = vunpack.c.l.s8.bf16 %v444_v52  ;;  %v782_v57 = vunpack.c.l.s8.bf16 %v446_v53  ;;  %v810_v63 = vunpack.c.h.s8.bf16 %v446_v53 }
 0x1cc   : > { %v976_v34 = vunpack.c.h.s8.bf16 %v528_v23 }
 0x1cd   : > { %1458 = vmatmul.mubr.bf16.vlgmr.msra.gmra.mrb[20].mxu0 %v3140_v43  ;;  %1499 = vmatmul.mubr.bf16.vlgmr.msra.gmra.mrb[20].mxu1 %v3140_v43 }
 0x1ce   : > { %1508 = vmatpush1.bf16.msra.mxu0 %v555_v59  ;;  %1549 = vmatpush1.bf16.msra.mxu1 %v557_v60  ;;  %v445_v59 = vld [vmem:[%s3068_s29 + $0x450] sm:$0xff]  ;;  %v779_v60 = vunpack.c.l.s8.bf16 %v443_v58 }
 0x1cf   : > { %1509 = vmatprep.subr.bf16.mxu0 %v584_v61  ;;  %1550 = vmatprep.subr.bf16.mxu1 %v586_v62  ;;  %v781_v61 = vunpack.c.l.s8.bf16 %v445_v59  ;;  %v808_v62 = vunpack.c.h.s8.bf16 %v444_v52 }
 0x1d0   : > { %1539 = vmatprep.mubr.bf16.mxu0 %v3110_v36  ;;  %1580 = vmatprep.mubr.bf16.mxu1 %v3110_v36  ;;  %v668_v36 = vunpack.c.l.s8.bf16 %v388_v11 }
 0x1d2   : > { %1510 = vmatpush1.bf16.msra.mxu0 %v583_v1  ;;  %1551 = vmatpush1.bf16.msra.mxu1 %v585_v2  ;;  %v474_v1 = vld [vmem:[%s3068_s29 + $0x538] sm:$0xff]  ;;  %v807_v2 = vunpack.c.h.s8.bf16 %v443_v58 }
 0x1d3   : > { %1511 = vmatprep.subr.bf16.mxu0 %v612_v3  ;;  %1552 = vmatprep.subr.bf16.mxu1 %v614_v4  ;;  %v809_v3 = vunpack.c.h.s8.bf16 %v445_v59  ;;  %v836_v4 = vunpack.c.l.s8.bf16 %v472_v0  ;;  %v838_v5 = vunpack.c.l.s8.bf16 %v474_v1  ;;  %v866_v11 = vunpack.c.h.s8.bf16 %v474_v1 }
 0x1d6   : > { %1512 = vmatpush1.bf16.msra.mxu0 %v611_v7  ;;  %1553 = vmatpush1.bf16.msra.mxu1 %v613_v8  ;;  %v473_v7 = vld [vmem:[%s3068_s29 + $0x530] sm:$0xff]  ;;  %v835_v8 = vunpack.c.l.s8.bf16 %v471_v6 }
 0x1d7   : > { %1513 = vmatprep.subr.bf16.mxu0 %v640_v9  ;;  %1554 = vmatprep.subr.bf16.mxu1 %v642_v10  ;;  %v837_v9 = vunpack.c.l.s8.bf16 %v473_v7  ;;  %v864_v10 = vunpack.c.h.s8.bf16 %v472_v0 }
 0x1da   : > { %1514 = vmatpush1.bf16.msra.mxu0 %v639_v13  ;;  %1555 = vmatpush1.bf16.msra.mxu1 %v641_v14  ;;  %v502_v13 = vld [vmem:[%s3068_s29 + $0x618] sm:$0xff]  ;;  %v863_v14 = vunpack.c.h.s8.bf16 %v471_v6  ;;  %v999_v6 = vld [vmem:[#allocation2 + $0xa0] sm:$0xff] }
 0x1db   : > { %1515 = vmatprep.subr.bf16.mxu0 %v668_v36  ;;  %1556 = vmatprep.subr.bf16.mxu1 %v670_v15  ;;  %v865_v36 = vunpack.c.h.s8.bf16 %v473_v7  ;;  %v892_v15 = vunpack.c.l.s8.bf16 %v500_v12  ;;  %v894_v16 = vunpack.c.l.s8.bf16 %v502_v13  ;;  %v922_v22 = vunpack.c.h.s8.bf16 %v502_v13  ;;  %v1001_v7 = vld [vmem:[#allocation2 + $0xb0] sm:$0xff] }
 0x1de   : > { %1516 = vmatpush1.bf16.msra.mxu0 %v667_v18  ;;  %1557 = vmatpush1.bf16.msra.mxu1 %v669_v19  ;;  %v501_v18 = vld [vmem:[%s3068_s29 + $0x610] sm:$0xff]  ;;  %v891_v19 = vunpack.c.l.s8.bf16 %v499_v17 }
 0x1df   : > { %1517 = vmatprep.subr.bf16.mxu0 %v696_v20  ;;  %1558 = vmatprep.subr.bf16.mxu1 %v698_v21  ;;  %v893_v20 = vunpack.c.l.s8.bf16 %v501_v18  ;;  %v920_v21 = vunpack.c.h.s8.bf16 %v500_v12 }
 0x1e0   : > { %v1213_v35 = vpop.f32.mrb[8].mxu0  ;;  %v1254_v37 = vpop.f32.mrb[8].mxu1 }
 0x1e1   : > { %v1597_v38 = vadd.f32 %v1213_v35, %v987_v24  ;;  %v1599_v39 = vadd.f32 %v1254_v37, %v989_v25  ;;  %v1215_v40 = vpop.f32.mrb[9].mxu0  ;;  %v1256_v41 = vpop.f32.mrb[9].mxu1  ;;  %v530_v24 = vld [vmem:[%s3068_s29 + $0x6f8] sm:$0xff]  ;;  %v919_v25 = vunpack.c.h.s8.bf16 %v499_v17 }
 0x1e2   : > { %v1598_v42 = vadd.f32 %v1215_v40, %v988_v26  ;;  %v1600_v44 = vadd.f32 %v1256_v41, %v990_v29  ;;  %v1217_v45 = vpop.f32.mrb[10].mxu0  ;;  %v1258_v46 = vpop.f32.mrb[10].mxu1  ;;  %1518 = vmatpush1.bf16.msra.mxu0 %v695_v27  ;;  %1559 = vmatpush1.bf16.msra.mxu1 %v697_v28  ;;  %v921_v26 = vunpack.c.h.s8.bf16 %v501_v18  ;;  %v948_v27 = vunpack.c.l.s8.bf16 %v528_v23  ;;  %v527_v29 = vld [vmem:[%s3068_s29 + $0x6e0] sm:$0xff]  ;;  %v993_v40 = vld [vmem:[#allocation2 + $0x70] sm:$0xff]  ;;  %v992_v41 = vld [vmem:[#allocation2 + $0x68] sm:$0xff] }
 0x1e3   : > { %1625 = vst [vmem:[#allocation2 + $0x40] sm:$0xff] %v1597_v38  ;;  %1627 = vst [vmem:[#allocation2 + $0x50] sm:$0xff] %v1599_v39  ;;  %v1218_v49 = vpop.f32.mrb[11].mxu0  ;;  %v1259_v31 = vpop.f32.mrb[11].mxu1  ;;  %1519 = vmatprep.subr.bf16.mxu0 %v724_v30  ;;  %1560 = vmatprep.subr.bf16.mxu1 %v726_v32  ;;  %v950_v28 = vunpack.c.l.s8.bf16 %v530_v24  ;;  %v529_v30 = vld [vmem:[%s3068_s29 + $0x6f0] sm:$0xff]  ;;  %v947_v32 = vunpack.c.l.s8.bf16 %v527_v29  ;;  %v978_v35 = vunpack.c.h.s8.bf16 %v530_v24  ;;  %v975_v37 = vunpack.c.h.s8.bf16 %v527_v29  ;;  %v991_v39 = vld [vmem:[#allocation2 + $0x60] sm:$0xff] }
 0x1e4   : > { %1626 = vst [vmem:[#allocation2 + $0x48] sm:$0xff] %v1598_v42  ;;  %1628 = vst [vmem:[#allocation2 + $0x58] sm:$0xff] %v1600_v44  ;;  %v949_v33 = vunpack.c.l.s8.bf16 %v529_v30  ;;  %v977_v38 = vunpack.c.h.s8.bf16 %v529_v30  ;;  %v994_v42 = vld [vmem:[#allocation2 + $0x78] sm:$0xff]  ;;  %v1004_v23 = vld [vmem:[#allocation2 + $0xc8] sm:$0xff] }
 0x1e5   : > { %v1006_v24 = vld [vmem:[#allocation2 + $0xd8] sm:$0xff] }
 0x1e6   : > { %1520 = vmatpush1.bf16.msra.mxu0 %v723_v47  ;;  %1561 = vmatpush1.bf16.msra.mxu1 %v725_v48 }
 0x1e7   : > { %1521 = vmatprep.subr.bf16.mxu0 %v752_v50  ;;  %1562 = vmatprep.subr.bf16.mxu1 %v754_v51 }
 0x1ea   : > { %1522 = vmatpush1.bf16.msra.mxu0 %v751_v54  ;;  %1563 = vmatpush1.bf16.msra.mxu1 %v753_v55  ;;  %v997_v55 = vld [vmem:[#allocation2 + $0x90] sm:$0xff] }
 0x1eb   : > { %1523 = vmatprep.subr.bf16.mxu0 %v780_v56  ;;  %1564 = vmatprep.subr.bf16.mxu1 %v782_v57  ;;  %v996_v56 = vld [vmem:[#allocation2 + $0x88] sm:$0xff]  ;;  %v998_v57 = vld [vmem:[#allocation2 + $0x98] sm:$0xff] }
 0x1ee   : > { %1524 = vmatpush1.bf16.msra.mxu0 %v779_v60  ;;  %1565 = vmatpush1.bf16.msra.mxu1 %v781_v61 }
 0x1ef   : > { %1525 = vmatprep.subr.bf16.mxu0 %v808_v62  ;;  %1566 = vmatprep.subr.bf16.mxu1 %v810_v63 }
 0x1f2   : > { %1526 = vmatpush1.bf16.msra.mxu0 %v807_v2  ;;  %1567 = vmatpush1.bf16.msra.mxu1 %v809_v3 }
 0x1f3   : > { %1527 = vmatprep.subr.bf16.mxu0 %v836_v4  ;;  %1568 = vmatprep.subr.bf16.mxu1 %v838_v5 }
 0x1f6   : > { %1528 = vmatpush1.bf16.msra.mxu0 %v835_v8  ;;  %1569 = vmatpush1.bf16.msra.mxu1 %v837_v9  ;;  %v1000_v8 = vld [vmem:[#allocation2 + $0xa8] sm:$0xff]  ;;  %v1002_v9 = vld [vmem:[#allocation2 + $0xb8] sm:$0xff] }
 0x1f7   : > { %1529 = vmatprep.subr.bf16.mxu0 %v864_v10  ;;  %1570 = vmatprep.subr.bf16.mxu1 %v866_v11 }
 0x1fa   : > { %1530 = vmatpush1.bf16.msra.mxu0 %v863_v14  ;;  %1571 = vmatpush1.bf16.msra.mxu1 %v865_v36 }
 0x1fb   : > { %1531 = vmatprep.subr.bf16.mxu0 %v892_v15  ;;  %1572 = vmatprep.subr.bf16.mxu1 %v894_v16 }
 0x1fe   : > { %1532 = vmatpush1.bf16.msra.mxu0 %v891_v19  ;;  %1573 = vmatpush1.bf16.msra.mxu1 %v893_v20 }
 0x1ff   : > { %1533 = vmatprep.subr.bf16.mxu0 %v920_v21  ;;  %1574 = vmatprep.subr.bf16.mxu1 %v922_v22  ;;  %v1003_v21 = vld [vmem:[#allocation2 + $0xc0] sm:$0xff]  ;;  %v1005_v22 = vld [vmem:[#allocation2 + $0xd0] sm:$0xff] }
 0x202   : > { %1534 = vmatpush1.bf16.msra.mxu0 %v919_v25  ;;  %1575 = vmatpush1.bf16.msra.mxu1 %v921_v26 }
 0x203   : > { %1535 = vmatprep.subr.bf16.mxu0 %v948_v27  ;;  %1576 = vmatprep.subr.bf16.mxu1 %v950_v28 }
 0x206   : > { %1536 = vmatpush1.bf16.msra.mxu0 %v947_v32  ;;  %1577 = vmatpush1.bf16.msra.mxu1 %v949_v33 }
 0x207   : > { %1537 = vmatprep.subr.bf16.mxu0 %v976_v34  ;;  %1578 = vmatprep.subr.bf16.mxu1 %v978_v35 }
 0x20a   : > { %1538 = vmatpush1.bf16.msra.mxu0 %v975_v37  ;;  %1579 = vmatpush1.bf16.msra.mxu1 %v977_v38 }
 0x20d   : > { %1540 = vmatmul.mubr.bf16.vlgmr.msra.gmra.mrb[24].mxu0 %v3140_v43  ;;  %1581 = vmatmul.mubr.bf16.vlgmr.msra.gmra.mrb[24].mxu1 %v3140_v43  ;;  %v995_v43 = vld [vmem:[#allocation2 + $0x80] sm:$0xff] }
 0x220   : > { %v1295_v44 = vpop.f32.mrb[12].mxu0  ;;  %v1336_v45 = vpop.f32.mrb[12].mxu1 }
 0x221   : > { %v1601_v46 = vadd.f32 %v1295_v44, %v991_v39  ;;  %v1603_v47 = vadd.f32 %v1336_v45, %v993_v40  ;;  %v1297_v48 = vpop.f32.mrb[13].mxu0  ;;  %v1338_v49 = vpop.f32.mrb[13].mxu1  ;;  %v1705_v39 = vlaneseq (!%p2752_p6) }
 0x222   : > { %v1602_v31 = vadd.f32 %v1297_v48, %v992_v41  ;;  %v1604_v50 = vadd.f32 %v1338_v49, %v994_v42  ;;  %v1299_v51 = vpop.f32.mrb[14].mxu0  ;;  %v1340_v52 = vpop.f32.mrb[14].mxu1  ;;  %v1649_v41 = vld [vmem:[%s3090_s12] sm:$0x77] (!%p2752_p6)  ;;  %v1650_v42 = vld [vmem:[%s3090_s12 + $0x8] sm:$0x77] (!%p2752_p6) }
 0x223   : > { %1629 = vst [vmem:[#allocation2 + $0x60] sm:$0xff] %v1601_v46  ;;  %1631 = vst [vmem:[#allocation2 + $0x70] sm:$0xff] %v1603_v47  ;;  %v1300_v53 = vpop.f32.mrb[15].mxu0  ;;  %v1341_v54 = vpop.f32.mrb[15].mxu1  ;;  %v1706_v40 = vshrl.u32 (!%p2752_p6), %v1705_v39, 7 }
 0x224   : > { %1630 = vst [vmem:[#allocation2 + $0x68] sm:$0xff] %v1602_v31  ;;  %1632 = vst [vmem:[#allocation2 + $0x78] sm:$0xff] %v1604_v50  ;;  %v1663_v31 = vld [vmem:[#allocation2] sm:$0xff] (!%p2752_p6)  ;;  %v1664_v54 = vld [vmem:[#allocation2 + $0x8] sm:$0xff] (!%p2752_p6) }
 0x225   : > { %v3359_v44 = vsub.s32 (!%p2752_p6), 0, %v1706_v40  ;;  %v3361_v45 = vsub.s32 (!%p2752_p6), 4, %v1706_v40  ;;  %v3363_v46 = vsub.s32 (!%p2752_p6), 1, %v1706_v40  ;;  %v3365_v47 = vsub.s32 (!%p2752_p6), 5, %v1706_v40 }
 0x226   : > { %v3367_v48 = vsub.s32 (!%p2752_p6), 2, %v1706_v40  ;;  %v3369_v49 = vsub.s32 (!%p2752_p6), 6, %v1706_v40 }
 0x227   : > { %v1708_v50 = vrot.slane (!%p2752_p6), %v1649_v41, %v3359_v44  ;;  %v1712_v51 = vrot.slane (!%p2752_p6), %v1649_v41, %v3361_v45  ;;  %v1716_v52 = vrot.slane (!%p2752_p6), %v1650_v42, %v3359_v44  ;;  %v1720_v53 = vrot.slane (!%p2752_p6), %v1650_v42, %v3361_v45 }
 0x260   : > { %v1377_v58 = vpop.f32.mrb[16].mxu0  ;;  %v1418_v59 = vpop.f32.mrb[16].mxu1 }
 0x261   : > { %v1605_v60 = vadd.f32 %v1377_v58, %v995_v43  ;;  %v1607_v61 = vadd.f32 %v1418_v59, %v997_v55  ;;  %v1379_v62 = vpop.f32.mrb[17].mxu0  ;;  %v1420_v63 = vpop.f32.mrb[17].mxu1  ;;  %v1665_v43 = vld [vmem:[#allocation2 + $0x10] sm:$0xff] (!%p2752_p6)  ;;  %v1666_v55 = vld [vmem:[#allocation2 + $0x18] sm:$0xff] (!%p2752_p6)  ;;  %v2024_v58 = vrot.slane (!%p2752_p6), %v1650_v42, %v3363_v46  ;;  %v2028_v59 = vrot.slane (!%p2752_p6), %v1650_v42, %v3365_v47 }
 0x262   : > { %v1606_v0 = vadd.f32 %v1379_v62, %v996_v56  ;;  %v1608_v1 = vadd.f32 %v1420_v63, %v998_v57  ;;  %v1381_v2 = vpop.f32.mrb[18].mxu0  ;;  %v1422_v3 = vpop.f32.mrb[18].mxu1  ;;  %v2016_v56 = vrot.slane (!%p2752_p6), %v1649_v41, %v3363_v46  ;;  %v2020_v57 = vrot.slane (!%p2752_p6), %v1649_v41, %v3365_v47 }
 0x263   : > { %1633 = vst [vmem:[#allocation2 + $0x80] sm:$0xff] %v1605_v60  ;;  %1635 = vst [vmem:[#allocation2 + $0x90] sm:$0xff] %v1607_v61  ;;  %v1382_v4 = vpop.f32.mrb[19].mxu0  ;;  %v1423_v5 = vpop.f32.mrb[19].mxu1  ;;  %v1848_v60 = vrot.slane (!%p2752_p6), %v1708_v50, %v3359_v44  ;;  %v1852_v61 = vrot.slane (!%p2752_p6), %v1712_v51, %v3359_v44  ;;  %v1856_v62 = vrot.slane (!%p2752_p6), %v1716_v52, %v3359_v44 }
 0x264   : > { %1634 = vst [vmem:[#allocation2 + $0x88] sm:$0xff] %v1606_v0  ;;  %1636 = vst [vmem:[#allocation2 + $0x98] sm:$0xff] %v1608_v1  ;;  %v1860_v63 = vrot.slane (!%p2752_p6), %v1720_v53, %v3359_v44  ;;  %v2156_v0 = vrot.slane (!%p2752_p6), %v2016_v56, %v3363_v46  ;;  %v2160_v1 = vrot.slane (!%p2752_p6), %v2020_v57, %v3363_v46 }
 0x265   : > { %v2164_v2 = vrot.slane (!%p2752_p6), %v2024_v58, %v3363_v46  ;;  %v2168_v3 = vrot.slane (!%p2752_p6), %v2028_v59, %v3363_v46  ;;  %v1957_v4 = vadd.f32 (!%p2752_p6), %v1848_v60, %v1663_v31  ;;  %v1958_v5 = vadd.f32 (!%p2752_p6), %v1852_v61, %v1664_v54 }
 0x2a0   : > { %v1459_v10 = vpop.f32.mrb[20].mxu0  ;;  %v1500_v11 = vpop.f32.mrb[20].mxu1 }
 0x2a1   : > { %v1609_v12 = vadd.f32 %v1459_v10, %v999_v6  ;;  %v1611_v13 = vadd.f32 %v1500_v11, %v1001_v7  ;;  %v1461_v14 = vpop.f32.mrb[21].mxu0  ;;  %v1502_v36 = vpop.f32.mrb[21].mxu1  ;;  %v1959_v6 = vadd.f32 (!%p2752_p6), %v1856_v62, %v1665_v43  ;;  %v1960_v7 = vadd.f32 (!%p2752_p6), %v1860_v63, %v1666_v55 }
 0x2a2   : > { %v1610_v15 = vadd.f32 %v1461_v14, %v1000_v8  ;;  %v1612_v16 = vadd.f32 %v1502_v36, %v1002_v9  ;;  %v1463_v17 = vpop.f32.mrb[22].mxu0  ;;  %v1504_v18 = vpop.f32.mrb[22].mxu1  ;;  %v2296_v8 = vrot.slane (!%p2752_p6), %v1649_v41, %v3367_v48  ;;  %v2300_v9 = vrot.slane (!%p2752_p6), %v1649_v41, %v3369_v49 }
 0x2a3   : > { %1637 = vst [vmem:[#allocation2 + $0xa0] sm:$0xff] %v1609_v12  ;;  %1639 = vst [vmem:[#allocation2 + $0xb0] sm:$0xff] %v1611_v13  ;;  %v1464_v19 = vpop.f32.mrb[23].mxu0  ;;  %v1505_v20 = vpop.f32.mrb[23].mxu1  ;;  %v2304_v10 = vrot.slane (!%p2752_p6), %v1650_v42, %v3367_v48  ;;  %v2308_v11 = vrot.slane (!%p2752_p6), %v1650_v42, %v3369_v49  ;;  %v1653_v12 = vld [vmem:[%s3090_s12 + $0x20] sm:$0x77] (!%p2752_p6) }
 0x2a4   : > { %1638 = vst [vmem:[#allocation2 + $0xa8] sm:$0xff] %v1610_v15  ;;  %1640 = vst [vmem:[#allocation2 + $0xb8] sm:$0xff] %v1612_v16  ;;  %v1985_v13 = vmax.f32 (!%p2752_p6), %v1957_v4, 0.0  ;;  %v1986_v14 = vmax.f32 (!%p2752_p6), %v1958_v5, 0.0  ;;  %v1987_v36 = vmax.f32 (!%p2752_p6), %v1959_v6, 0.0  ;;  %v1988_v15 = vmax.f32 (!%p2752_p6), %v1960_v7, 0.0 }
 0x2a5   : > { %v1654_v16 = vld [vmem:[%s3090_s12 + $0x28] sm:$0x77] (!%p2752_p6)  ;;  %v2436_v17 = vrot.slane (!%p2752_p6), %v2296_v8, %v3367_v48  ;;  %v2440_v18 = vrot.slane (!%p2752_p6), %v2300_v9, %v3367_v48  ;;  %v2444_v19 = vrot.slane (!%p2752_p6), %v2304_v10, %v3367_v48  ;;  %v2448_v20 = vrot.slane (!%p2752_p6), %v2308_v11, %v3367_v48  ;;  %v3415_v4 = vld [vmem:[%s3090_s12 + $0x10] sm:$0x77] (!%p2752_p6)  ;;  %v3420_v9 = vld [vmem:[%s3090_s12 + $0x18] sm:$0x77] (!%p2752_p6) }
 0x2a6   : > { %v2048_v50 = vrot.slane (!%p2752_p6), %v1653_v12, %v3363_v46  ;;  %v2052_v51 = vrot.slane (!%p2752_p6), %v1653_v12, %v3365_v47  ;;  %v2056_v52 = vrot.slane (!%p2752_p6), %v1654_v16, %v3363_v46  ;;  %v2060_v57 = vrot.slane (!%p2752_p6), %v1654_v16, %v3365_v47 }
 0x2a7   : > { %v2332_v7 = vrot.slane (!%p2752_p6), %v1653_v12, %v3369_v49  ;;  %v2336_v8 = vrot.slane (!%p2752_p6), %v1654_v16, %v3367_v48 }
 0x2a8   : > { %v2188_v58 = vrot.slane (!%p2752_p6), %v2048_v50, %v3363_v46  ;;  %v2192_v59 = vrot.slane (!%p2752_p6), %v2052_v51, %v3363_v46 }
 0x2de   : > { %1648 = sbr.rel (%p2752_p6) target bundleno = 954 (0x3ba), region = 44 }
 0x2e0   : > { %v1541_v25 = vpop.f32.mrb[24].mxu0  ;;  %v1582_v26 = vpop.f32.mrb[24].mxu1 }
 0x2e1   : > { %v1613_v27 = vadd.f32 %v1541_v25, %v1003_v21  ;;  %v1615_v28 = vadd.f32 %v1582_v26, %v1005_v22  ;;  %v1543_v29 = vpop.f32.mrb[25].mxu0  ;;  %v1584_v30 = vpop.f32.mrb[25].mxu1  ;;  %v2265_v21 = vmul.f32 (!%p2752_p6), %v2156_v0, %v1985_v13  ;;  %v2266_v22 = vmul.f32 (!%p2752_p6), %v2160_v1, %v1986_v14  ;;  %v1671_v25 = vld [vmem:[#allocation2 + $0x40] sm:$0xff] (!%p2752_p6) }
 0x2e2   : > { %v1614_v32 = vadd.f32 %v1543_v29, %v1004_v23  ;;  %v1616_v33 = vadd.f32 %v1584_v30, %v1006_v24  ;;  %v1545_v34 = vpop.f32.mrb[26].mxu0  ;;  %v1586_v35 = vpop.f32.mrb[26].mxu1  ;;  %v2267_v23 = vmul.f32 (!%p2752_p6), %v2164_v2, %v1987_v36  ;;  %v2268_v24 = vmul.f32 (!%p2752_p6), %v2168_v3, %v1988_v15 }
 0x2e3   : > { %1641 = vst [vmem:[#allocation2 + $0xc0] sm:$0xff] %v1613_v27  ;;  %1643 = vst [vmem:[#allocation2 + $0xd0] sm:$0xff] %v1615_v28  ;;  %v1546_v37 = vpop.f32.mrb[27].mxu0  ;;  %v1587_v38 = vpop.f32.mrb[27].mxu1  ;;  %v1740_v26 = vrot.slane (!%p2752_p6), %v1653_v12, %v3359_v44  ;;  %v1744_v27 = vrot.slane (!%p2752_p6), %v1653_v12, %v3361_v45  ;;  %v1748_v28 = vrot.slane (!%p2752_p6), %v1654_v16, %v3359_v44  ;;  %v1672_v35 = vld [vmem:[#allocation2 + $0x48] sm:$0xff] (!%p2752_p6) }
 0x2e4   : > { %1642 = vst [vmem:[#allocation2 + $0xc8] sm:$0xff] %v1614_v32  ;;  %1644 = vst [vmem:[#allocation2 + $0xd8] sm:$0xff] %v1616_v33  ;;  %v1752_v29 = vrot.slane (!%p2752_p6), %v1654_v16, %v3361_v45  ;;  %v2545_v30 = vadd.f32 (!%p2752_p6), %v2436_v17, %v2265_v21  ;;  %v2546_v32 = vadd.f32 (!%p2752_p6), %v2440_v18, %v2266_v22  ;;  %v1673_v37 = vld [vmem:[#allocation2 + $0x50] sm:$0xff] (!%p2752_p6)  ;;  %v1674_v38 = vld [vmem:[#allocation2 + $0x58] sm:$0xff] (!%p2752_p6) }
 0x2e5   : > { %v2547_v33 = vadd.f32 %v2444_v19, %v2267_v23  ;;  %v2548_v34 = vadd.f32 %v2448_v20, %v2268_v24  ;;  %v1880_v39 = vrot.slane %v1740_v26, %v3359_v44  ;;  %v1884_v40 = vrot.slane %v1744_v27, %v3359_v44  ;;  %v1667_v20 = vld [vmem:[#allocation2 + $0x20] sm:$0xff]  ;;  %v1668_v21 = vld [vmem:[#allocation2 + $0x28] sm:$0xff]  ;;  %v1670_v26 = vld [vmem:[#allocation2 + $0x38] sm:$0xff] }
 0x2e6   : > { %v1888_v41 = vrot.slane %v1748_v28, %v3359_v44  ;;  %v1892_v42 = vrot.slane %v1752_v29, %v3359_v44  ;;  %v2573_v31 = vadd.f32 %v2546_v32, %v2545_v30  ;;  %v2196_v1 = vrot.slane %v2056_v52, %v3363_v46 }
 0x2e7   : > { %v1965_v53 = vadd.f32 %v1880_v39, %v1671_v25  ;;  %v1966_v54 = vadd.f32 %v1884_v40, %v1672_v35  ;;  %v2200_v2 = vrot.slane %v2060_v57, %v3363_v46  ;;  %v2328_v3 = vrot.slane %v1653_v12, %v3367_v48  ;;  %v1669_v25 = vld [vmem:[#allocation2 + $0x30] sm:$0xff] }
 0x2e8   : > { %v1967_v43 = vadd.f32 %v1888_v41, %v1673_v37  ;;  %v1968_v55 = vadd.f32 %v1892_v42, %v1674_v38  ;;  %v2574_v56 = vadd.f32 %v2573_v31, %v2547_v33  ;;  %v2340_v13 = vrot.slane %v1654_v16, %v3369_v49 }
 0x2e9   : > { %v1993_v60 = vmax.f32 %v1965_v53, 0.0  ;;  %v1994_v61 = vmax.f32 %v1966_v54, 0.0  ;;  %v2468_v14 = vrot.slane %v2328_v3, %v3367_v48  ;;  %v2472_v36 = vrot.slane %v2332_v7, %v3367_v48 }
 0x2ea   : > { %v1995_v62 = vmax.f32 %v1967_v43, 0.0  ;;  %v1996_v63 = vmax.f32 %v1968_v55, 0.0  ;;  %v2575_v0 = vadd.f32 %v2574_v56, %v2548_v34  ;;  %v2476_v15 = vrot.slane %v2336_v8, %v3367_v48  ;;  %v3451_v56 = vld [vmem:[%s3090_s12 + $0x30] sm:$0x77] }
 0x2eb   : > { %v2273_v5 = vmul.f32 %v2188_v58, %v1993_v60  ;;  %v2274_v6 = vmul.f32 %v2192_v59, %v1994_v61  ;;  %v1724_v17 = vrot.slane %v3415_v4, %v3359_v44  ;;  %v1728_v12 = vrot.slane %v3415_v4, %v3361_v45  ;;  %v3457_v61 = vld [vmem:[%s3090_s12 + $0x38] sm:$0x77] }
 0x2ec   : > { %2576 = vadd.xlane.f32.xlu0 %v2575_v0  ;;  %v2275_v10 = vmul.f32 %v2196_v1, %v1995_v62  ;;  %v2276_v11 = vmul.f32 %v2200_v2, %v1996_v63  ;;  %v2480_v18 = vrot.slane %v2340_v13, %v3367_v48  ;;  %v1732_v16 = vrot.slane %v3420_v9, %v3359_v44 }
 0x2ed   : > { %v2553_v19 = vadd.f32 %v2468_v14, %v2273_v5  ;;  %v1736_v22 = vrot.slane %v3420_v9, %v3361_v45  ;;  %v2554_v23 = vadd.f32 %v2472_v36, %v2274_v6  ;;  %v1864_v27 = vrot.slane %v1724_v17, %v3359_v44  ;;  %v1677_v36 = vld [vmem:[#allocation2 + $0x70] sm:$0xff] }
 0x2ee   : > { %v2555_v24 = vadd.f32 %v2476_v15, %v2275_v10  ;;  %v1868_v28 = vrot.slane %v1728_v12, %v3359_v44  ;;  %v2556_v29 = vadd.f32 %v2480_v18, %v2276_v11  ;;  %v1872_v30 = vrot.slane %v1732_v16, %v3359_v44  ;;  %v1675_v10 = vld [vmem:[#allocation2 + $0x60] sm:$0xff] }
 0x2ef   : > { %v1876_v32 = vrot.slane %v1736_v22, %v3359_v44  ;;  %v2032_v33 = vrot.slane %v3415_v4, %v3363_v46  ;;  %v2587_v34 = vadd.f32 %v2554_v23, %v2553_v19  ;;  %v1961_v35 = vadd.f32 %v1864_v27, %v1667_v20  ;;  %v1678_v19 = vld [vmem:[#allocation2 + $0x78] sm:$0xff] }
 0x2f0   : > { %v1962_v37 = vadd.f32 %v1868_v28, %v1668_v21  ;;  %v2036_v38 = vrot.slane %v3415_v4, %v3365_v47  ;;  %v1963_v39 = vadd.f32 %v1872_v30, %v1669_v25  ;;  %v2040_v41 = vrot.slane %v3420_v9, %v3363_v46 }
 0x2f1   : > { %v1964_v40 = vadd.f32 %v1876_v32, %v1670_v26  ;;  %v2044_v42 = vrot.slane %v3420_v9, %v3365_v47  ;;  %v2588_v31 = vadd.f32 %v2587_v34, %v2555_v24  ;;  %v1989_v50 = vmax.f32 %v1961_v35, 0.0 }
 0x2f2   : > { %v1990_v51 = vmax.f32 %v1962_v37, 0.0  ;;  %v2172_v52 = vrot.slane %v2032_v33, %v3363_v46  ;;  %v1991_v53 = vmax.f32 %v1963_v39, 0.0  ;;  %v2176_v43 = vrot.slane %v2036_v38, %v3363_v46 }
 0x2f3   : > { %v1992_v54 = vmax.f32 %v1964_v40, 0.0  ;;  %v2180_v55 = vrot.slane %v2040_v41, %v3363_v46  ;;  %v2589_v57 = vadd.f32 %v2588_v31, %v2556_v29  ;;  %v2184_v58 = vrot.slane %v2044_v42, %v3363_v46  ;;  %v3494_v31 = vld [vmem:[%s3090_s12 + $0x40] sm:$0x77] }
 0x2f4   : > { %v2269_v59 = vmul.f32 %v2172_v52, %v1989_v50  ;;  %v2312_v60 = vrot.slane %v3415_v4, %v3367_v48  ;;  %v2270_v62 = vmul.f32 %v2176_v43, %v1990_v51  ;;  %v2316_v0 = vrot.slane %v3415_v4, %v3369_v49 }
 0x2f5   : > { %v2271_v63 = vmul.f32 %v2180_v55, %v1991_v53  ;;  %v2320_v1 = vrot.slane %v3420_v9, %v3367_v48  ;;  %2590 = vadd.xlane.f32.xlu1 %v2589_v57  ;;  %v2272_v2 = vmul.f32 %v2184_v58, %v1992_v54  ;;  %v2324_v3 = vrot.slane %v3420_v9, %v3369_v49  ;;  %v1676_v9 = vld [vmem:[#allocation2 + $0x68] sm:$0xff] }
 0x2f6   : > { %v2452_v5 = vrot.slane %v2312_v60, %v3367_v48  ;;  %v1756_v6 = vrot.slane %v3451_v56, %v3359_v44  ;;  %v2456_v7 = vrot.slane %v2316_v0, %v3367_v48  ;;  %v1760_v4 = vrot.slane %v3451_v56, %v3361_v45  ;;  %v1658_v54 = vld [vmem:[%s3090_s12 + $0x48] sm:$0x77]  ;;  %v1679_v0 = vld [vmem:[#allocation2 + $0x80] sm:$0xff] }
 0x2f7   : > { %v2460_v8 = vrot.slane %v2320_v1, %v3367_v48  ;;  %v1764_v11 = vrot.slane %v3457_v61, %v3359_v44  ;;  %v2464_v13 = vrot.slane %v2324_v3, %v3367_v48  ;;  %v1768_v15 = vrot.slane %v3457_v61, %v3361_v45 }
 0x2f8   : > { %v2549_v14 = vadd.f32 %v2452_v5, %v2269_v59  ;;  %v1896_v17 = vrot.slane %v1756_v6, %v3359_v44  ;;  %v2550_v12 = vadd.f32 %v2456_v7, %v2270_v62  ;;  %v1900_v20 = vrot.slane %v1760_v4, %v3359_v44  ;;  %v1680_v7 = vld [vmem:[#allocation2 + $0x88] sm:$0xff] }
 0x2f9   : > { %v2551_v18 = vadd.f32 %v2460_v8, %v2271_v63  ;;  %v1904_v21 = vrot.slane %v1764_v11, %v3359_v44  ;;  %v2552_v16 = vadd.f32 %v2464_v13, %v2272_v2  ;;  %v1908_v22 = vrot.slane %v1768_v15, %v3359_v44  ;;  %v1681_v8 = vld [vmem:[#allocation2 + $0x90] sm:$0xff] }
 0x2fa   : > { %v1969_v23 = vadd.f32 %v1896_v17, %v1675_v10  ;;  %v2064_v24 = vrot.slane %v3451_v56, %v3363_v46  ;;  %v2580_v25 = vadd.f32 %v2550_v12, %v2549_v14  ;;  %v1970_v26 = vadd.f32 %v1900_v20, %v1676_v9  ;;  %v1682_v10 = vld [vmem:[#allocation2 + $0x98] sm:$0xff] }
 0x2fb   : > { %v1971_v27 = vadd.f32 %v1904_v21, %v1677_v36  ;;  %v2068_v28 = vrot.slane %v3451_v56, %v3365_v47  ;;  %v1972_v29 = vadd.f32 %v1908_v22, %v1678_v19  ;;  %v2072_v32 = vrot.slane %v3457_v61, %v3363_v46 }
 0x2fc   : > { %v1997_v30 = vmax.f32 %v1969_v23, 0.0  ;;  %v2076_v33 = vrot.slane %v3457_v61, %v3365_v47  ;;  %v2581_v34 = vadd.f32 %v2580_v25, %v2551_v18  ;;  %v1998_v35 = vmax.f32 %v1970_v26, 0.0 }
 0x2fd   : > { %v1999_v37 = vmax.f32 %v1971_v27, 0.0  ;;  %v2204_v38 = vrot.slane %v2064_v24, %v3363_v46  ;;  %v2000_v39 = vmax.f32 %v1972_v29, 0.0  ;;  %v2208_v40 = vrot.slane %v2068_v28, %v3363_v46 }
 0x2fe   : > { %v2212_v41 = vrot.slane %v2072_v32, %v3363_v46  ;;  %v2216_v42 = vrot.slane %v2076_v33, %v3363_v46  ;;  %v2582_v50 = vadd.f32 %v2581_v34, %v2552_v16  ;;  %v2344_v52 = vrot.slane %v3451_v56, %v3367_v48  ;;  %v3530_v34 = vld [vmem:[%s3090_s12 + $0x50] sm:$0x77] }
 0x2ff   : > { %v2277_v51 = vmul.f32 %v2204_v38, %v1997_v30  ;;  %v2348_v53 = vrot.slane %v3451_v56, %v3369_v49  ;;  %v2278_v43 = vmul.f32 %v2208_v40, %v1998_v35  ;;  %v2352_v58 = vrot.slane %v3457_v61, %v3367_v48  ;;  %v3538_v40 = vld [vmem:[%s3090_s12 + $0x58] sm:$0x77] }
 0x300   : > { %v2279_v55 = vmul.f32 %v2212_v41, %v1999_v37  ;;  %v2280_v57 = vmul.f32 %v2216_v42, %v2000_v39  ;;  %2583 = vadd.xlane.f32.xlu0 %v2582_v50  ;;  %v2356_v59 = vrot.slane %v3457_v61, %v3369_v49  ;;  %v2484_v60 = vrot.slane %v2344_v52, %v3367_v48 }
 0x301   : > { %v2488_v62 = vrot.slane %v2348_v53, %v3367_v48  ;;  %v1772_v63 = vrot.slane %v3494_v31, %v3359_v44  ;;  %v2492_v56 = vrot.slane %v2352_v58, %v3367_v48  ;;  %v1776_v1 = vrot.slane %v3494_v31, %v3361_v45 }
 0x302   : > { %v1780_v2 = vrot.slane %v1658_v54, %v3359_v44  ;;  %v1784_v3 = vrot.slane %v1658_v54, %v3361_v45  ;;  %v2496_v5 = vrot.slane %v2356_v59, %v3367_v48  ;;  %v2557_v61 = vadd.f32 %v2484_v60, %v2277_v51 }
 0x303   : > { %v2558_v6 = vadd.f32 %v2488_v62, %v2278_v43  ;;  %v1912_v4 = vrot.slane %v1772_v63, %v3359_v44  ;;  %v2559_v11 = vadd.f32 %v2492_v56, %v2279_v55  ;;  %v1916_v13 = vrot.slane %v1776_v1, %v3359_v44  ;;  %v1684_v56 = vld [vmem:[#allocation2 + $0xa8] sm:$0xff]  ;;  %v1686_v1 = vld [vmem:[#allocation2 + $0xb8] sm:$0xff] }
 0x304   : > { %v1920_v14 = vrot.slane %v1780_v2, %v3359_v44  ;;  %v1924_v9 = vrot.slane %v1784_v3, %v3359_v44  ;;  %v2560_v36 = vadd.f32 %v2496_v5, %v2280_v57  ;;  %v2080_v12 = vrot.slane %v3494_v31, %v3363_v46  ;;  %v1683_v57 = vld [vmem:[#allocation2 + $0xa0] sm:$0xff] }
 0x305   : > { %v2594_v15 = vadd.f32 %v2558_v6, %v2557_v61  ;;  %v1973_v17 = vadd.f32 %v1912_v4, %v1679_v0  ;;  %v1974_v18 = vadd.f32 %v1916_v13, %v1680_v7  ;;  %v2084_v21 = vrot.slane %v3494_v31, %v3365_v47  ;;  %v1685_v0 = vld [vmem:[#allocation2 + $0xb0] sm:$0xff] }
 0x306   : > { %v1975_v19 = vadd.f32 %v1920_v14, %v1681_v8  ;;  %v1976_v20 = vadd.f32 %v1924_v9, %v1682_v10  ;;  %v2088_v23 = vrot.slane %v1658_v54, %v3363_v46  ;;  %v2092_v24 = vrot.slane %v1658_v54, %v3365_v47 }
 0x307   : > { %v2595_v16 = vadd.f32 %v2594_v15, %v2559_v11  ;;  %v2001_v22 = vmax.f32 %v1973_v17, 0.0  ;;  %v2002_v25 = vmax.f32 %v1974_v18, 0.0  ;;  %v2220_v28 = vrot.slane %v2080_v12, %v3363_v46 }
 0x308   : > { %v2003_v26 = vmax.f32 %v1975_v19, 0.0  ;;  %v2004_v27 = vmax.f32 %v1976_v20, 0.0  ;;  %v2224_v30 = vrot.slane %v2084_v21, %v3363_v46  ;;  %v2228_v32 = vrot.slane %v2088_v23, %v3363_v46 }
 0x309   : > { %v2596_v29 = vadd.f32 %v2595_v16, %v2560_v36  ;;  %v2232_v33 = vrot.slane %v2092_v24, %v3363_v46  ;;  %v2281_v35 = vmul.f32 %v2220_v28, %v2001_v22  ;;  %v2360_v37 = vrot.slane %v3494_v31, %v3367_v48  ;;  %v3568_v16 = vld [vmem:[%s3090_s12 + $0x60] sm:$0x77] }
 0x30a   : > { %v2364_v38 = vrot.slane %v3494_v31, %v3369_v49  ;;  %v2368_v39 = vrot.slane %v1658_v54, %v3367_v48  ;;  %v2282_v41 = vmul.f32 %v2224_v30, %v2002_v25  ;;  %v2283_v42 = vmul.f32 %v2228_v32, %v2003_v26  ;;  %v1662_v30 = vld [vmem:[%s3090_s12 + $0x68] sm:$0x77] }
 0x30b   : > { %2597 = vadd.xlane.f32.xlu1 %v2596_v29  ;;  %v2284_v50 = vmul.f32 %v2232_v33, %v2004_v27  ;;  %v2372_v51 = vrot.slane %v1658_v54, %v3369_v49  ;;  %v2500_v52 = vrot.slane %v2360_v37, %v3367_v48  ;;  %v1788_v55 = vrot.slane %v3530_v34, %v3359_v44 }
 0x30c   : > { %v2504_v53 = vrot.slane %v2364_v38, %v3367_v48  ;;  %v2508_v43 = vrot.slane %v2368_v39, %v3367_v48  ;;  %v1792_v58 = vrot.slane %v3530_v34, %v3361_v45  ;;  %v1796_v59 = vrot.slane %v3538_v40, %v3359_v44 }
 0x30d   : > { %v2512_v31 = vrot.slane %v2372_v51, %v3367_v48  ;;  %v1800_v54 = vrot.slane %v3538_v40, %v3361_v45  ;;  %v2561_v60 = vadd.f32 %v2500_v52, %v2281_v35  ;;  %v1928_v2 = vrot.slane %v1788_v55, %v3359_v44  ;;  %v1688_v51 = vld [vmem:[#allocation2 + $0xc8] sm:$0xff] }
 0x30e   : > { %v2562_v62 = vadd.f32 %v2504_v53, %v2282_v41  ;;  %v2563_v63 = vadd.f32 %v2508_v43, %v2283_v42  ;;  %v1932_v5 = vrot.slane %v1792_v58, %v3359_v44  ;;  %v1936_v61 = vrot.slane %v1796_v59, %v3359_v44  ;;  %v1690_v58 = vld [vmem:[#allocation2 + $0xd8] sm:$0xff] }
 0x30f   : > { %v2564_v3 = vadd.f32 %v2512_v31, %v2284_v50  ;;  %v1940_v6 = vrot.slane %v1800_v54, %v3359_v44  ;;  %v1977_v8 = vadd.f32 %v1928_v2, %v1683_v57  ;;  %v2096_v10 = vrot.slane %v3530_v34, %v3363_v46  ;;  %v1689_v57 = vld [vmem:[#allocation2 + $0xd0] sm:$0xff] }
 0x310   : > { %v2601_v7 = vadd.f32 %v2562_v62, %v2561_v60  ;;  %v2100_v4 = vrot.slane %v3530_v34, %v3365_v47  ;;  %v1978_v11 = vadd.f32 %v1932_v5, %v1684_v56  ;;  %v1979_v13 = vadd.f32 %v1936_v61, %v1685_v0 }
 0x311   : > { %v1980_v14 = vadd.f32 %v1940_v6, %v1686_v1  ;;  %v2104_v9 = vrot.slane %v3538_v40, %v3363_v46  ;;  %v2005_v15 = vmax.f32 %v1977_v8, 0.0  ;;  %v2108_v17 = vrot.slane %v3538_v40, %v3365_v47 }
 0x312   : > { %v2602_v36 = vadd.f32 %v2601_v7, %v2563_v63  ;;  %v2236_v12 = vrot.slane %v2096_v10, %v3363_v46  ;;  %v2006_v18 = vmax.f32 %v1978_v11, 0.0  ;;  %v2007_v19 = vmax.f32 %v1979_v13, 0.0 }
 0x313   : > { %v2008_v20 = vmax.f32 %v1980_v14, 0.0  ;;  %v2240_v21 = vrot.slane %v2100_v4, %v3363_v46  ;;  %v2244_v23 = vrot.slane %v2104_v9, %v3363_v46  ;;  %v2248_v24 = vrot.slane %v2108_v17, %v3363_v46 }
 0x314   : > { %v2603_v22 = vadd.f32 %v2602_v36, %v2564_v3  ;;  %v2285_v25 = vmul.f32 %v2236_v12, %v2005_v15  ;;  %v2376_v27 = vrot.slane %v3530_v34, %v3367_v48  ;;  %v2380_v28 = vrot.slane %v3530_v34, %v3369_v49  ;;  %v1687_v34 = vld [vmem:[#allocation2 + $0xc0] sm:$0xff] }
 0x315   : > { %v2286_v26 = vmul.f32 %v2240_v21, %v2006_v18  ;;  %v2384_v29 = vrot.slane %v3538_v40, %v3367_v48  ;;  %v2287_v32 = vmul.f32 %v2244_v23, %v2007_v19  ;;  %v2288_v33 = vmul.f32 %v2248_v24, %v2008_v20 }
 0x316   : > { %2604 = vadd.xlane.f32.xlu0 %v2603_v22  ;;  %v2388_v35 = vrot.slane %v3538_v40, %v3369_v49  ;;  %v1804_v37 = vrot.slane %v3568_v16, %v3359_v44  ;;  %v2516_v38 = vrot.slane %v2376_v27, %v3367_v48  ;;  %v2520_v39 = vrot.slane %v2380_v28, %v3367_v48 }
 0x317   : > { %v2524_v41 = vrot.slane %v2384_v29, %v3367_v48  ;;  %v1808_v42 = vrot.slane %v3568_v16, %v3361_v45  ;;  %v1812_v52 = vrot.slane %v1662_v30, %v3359_v44  ;;  %v1816_v40 = vrot.slane %v1662_v30, %v3361_v45 }
 0x318   : > { %v2528_v50 = vrot.slane %v2388_v35, %v3367_v48  ;;  %v1944_v53 = vrot.slane %v1804_v37, %v3359_v44  ;;  %v2565_v43 = vadd.f32 %v2516_v38, %v2285_v25  ;;  %v2566_v55 = vadd.f32 %v2520_v39, %v2286_v26 }
 0x319   : > { %v2567_v31 = vadd.f32 %v2524_v41, %v2287_v32  ;;  %v1948_v59 = vrot.slane %v1808_v42, %v3359_v44  ;;  %v1952_v60 = vrot.slane %v1812_v52, %v3359_v44  ;;  %v1956_v62 = vrot.slane %v1816_v40, %v3359_v44 }
 0x31a   : > { %v2568_v54 = vadd.f32 %v2528_v50, %v2288_v33  ;;  %v1981_v63 = vadd.f32 %v1944_v53, %v1687_v34  ;;  %v2608_v56 = vadd.f32 %v2566_v55, %v2565_v43  ;;  %v2112_v45 = vrot.slane %v3568_v16, %v3363_v46 }
 0x31b   : > { %v1982_v0 = vadd.f32 %v1948_v59, %v1688_v51  ;;  %v2116_v1 = vrot.slane %v3568_v16, %v3365_v47  ;;  %v1983_v2 = vadd.f32 %v1952_v60, %v1689_v57  ;;  %v1984_v3 = vadd.f32 %v1956_v62, %v1690_v58 }
 0x31c   : > { %v2009_v5 = vmax.f32 %v1981_v63, 0.0  ;;  %v2120_v61 = vrot.slane %v1662_v30, %v3363_v46  ;;  %v2609_v6 = vadd.f32 %v2608_v56, %v2567_v31  ;;  %v2124_v8 = vrot.slane %v1662_v30, %v3365_v47 }
 0x31d   : > { %v2010_v7 = vmax.f32 %v1982_v0, 0.0  ;;  %v2252_v44 = vrot.slane %v2112_v45, %v3363_v46  ;;  %v2011_v10 = vmax.f32 %v1983_v2, 0.0  ;;  %v2012_v4 = vmax.f32 %v1984_v3, 0.0 }
 0x31e   : > { %v2256_v11 = vrot.slane %v2116_v1, %v3363_v46  ;;  %v2260_v13 = vrot.slane %v2120_v61, %v3363_v46  ;;  %v2610_v14 = vadd.f32 %v2609_v6, %v2568_v54  ;;  %v2264_v9 = vrot.slane %v2124_v8, %v3363_v46 }
 0x31f   : > { %v2289_v36 = vmul.f32 %v2252_v44, %v2009_v5  ;;  %v2392_v15 = vrot.slane %v3568_v16, %v3367_v48  ;;  %v2396_v47 = vrot.slane %v3568_v16, %v3369_v49  ;;  %v2400_v18 = vrot.slane %v1662_v30, %v3367_v48 }
 0x320   : > { %v2290_v17 = vmul.f32 %v2256_v11, %v2010_v7  ;;  %v2291_v12 = vmul.f32 %v2260_v13, %v2011_v10  ;;  %2611 = vadd.xlane.f32.xlu1 %v2610_v14  ;;  %v2404_v19 = vrot.slane %v1662_v30, %v3369_v49  ;;  %v2292_v21 = vmul.f32 %v2264_v9, %v2012_v4 }
 0x321   : > { %v2532_v20 = vrot.slane %v2392_v15, %v3367_v48  ;;  %v2536_v46 = vrot.slane %v2396_v47, %v3367_v48  ;;  %v2540_v22 = vrot.slane %v2400_v18, %v3367_v48 }
 0x322   : > { %v2544_v23 = vrot.slane %v2404_v19, %v3367_v48 }
 0x323   : > { %v2569_v24 = vadd.f32 %v2532_v20, %v2289_v36  ;;  %v2570_v25 = vadd.f32 %v2536_v46, %v2290_v17  ;;  %v2571_v16 = vadd.f32 %v2540_v22, %v2291_v12 }
 0x324   : > { %v2572_v26 = vadd.f32 %v2544_v23, %v2292_v21 }
 0x325   : > { %v2615_v27 = vadd.f32 %v2570_v25, %v2569_v24 }
 0x327   : > { %v2616_v28 = vadd.f32 %v2615_v27, %v2571_v16 }
 0x329   : > { %v2617_v49 = vadd.f32 %v2616_v28, %v2572_v26 }
 0x32b   : > { %2618 = vadd.xlane.f32.xlu0 %v2617_v49 }
 0x379   : > { %v2577_v29 = vpop.xlane.xlu0 %2576 }
 0x37a   : > { %2579 = vst.msk [vmem:[%s3080_s28] sm:$0xff] %vm2578_vm0, %v2577_v29 }
 0x382   : > { %v2591_v30 = vpop.xlane.xlu1 %2590 }
 0x38d   : > { %v2584_v48 = vpop.xlane.xlu0 %2583 }
 0x38e   : > { %2586 = vst.msk [vmem:[%s3080_s28] sm:$0xff] %vm2585_vm1, %v2584_v48 }
 0x38f   : > { %2593 = vst.msk [vmem:[%s3080_s28] sm:$0xff] %vm2592_vm2, %v2591_v30 }
 0x398   : > { %v2598_v32 = vpop.xlane.xlu1 %2597 }
 0x399   : > { %2600 = vst.msk [vmem:[%s3080_s28] sm:$0xff] %vm2599_vm3, %v2598_v32 }
 0x3a3   : > { %v2605_v33 = vpop.xlane.xlu0 %2604 }
 0x3a4   : > { %2607 = vst.msk [vmem:[%s3080_s28] sm:$0xff] %vm2606_vm4, %v2605_v33 }
 0x3ad   : > { %v2612_v35 = vpop.xlane.xlu1 %2611 }
 0x3ae   : > { %2614 = vst.msk [vmem:[%s3080_s28] sm:$0xff] %vm2613_vm5, %v2612_v35 }
 0x3b8   : > { %v2619_v37 = vpop.xlane.xlu0 %2618 }
 0x3b9   : > { %2621 = vst.msk [vmem:[%s3080_s28] sm:$0xff] %vm2620_vm6, %v2619_v37 }
 0x3ba PF: > { %s16_s19 = sadd.s32 1, %s2932_s19   ;;  %s3653_s12 = smov %s2908_s13 }
 0x3bb   : > { %p13_p8 = scmp.ge.s32.totalorder %s16_s19, 8   ;;  %s3654_s13 = smov %s2912_s14 }
 0x3bc   : > { %s3655_s14 = smov %s3024_s4  ;;  %s3656_s15 = smov %s2924_s17 }
 0x3bd   : > { %s3657_s16 = smov %s2928_s18  ;;  %s3658_s17 = smov %s3661_s21 }
 0x3be   : > { %s3659_s18 = smov %s3665_s22  ;;  %15 = sbr.rel (!%p13_p8) target bundleno = 5 (0x5), region = 86 }
 0x3c5   :  { %2644 = vsyncpa [#allocation4], 1 }
 0x3c6   :  { %2646 = vsyncpa [#allocation4 + $0x1], 1 }

</bundles_post_ra>
